<compile_context>
chip_gen: v7x
topology: tpu7x:2x2x1
jax: 0.10.0
libtpu: 0.0.40
codegen_flags: <defaults>
</compile_context>

<pallas_src>
import functools
import math

import jax
import jax.numpy as jnp
from jax.experimental import pallas as pl
from jax.experimental.pallas import tpu as pltpu

F32_MIN = float(jnp.finfo(jnp.float32).min)
_MASK = -1e30  # additive causal-mask value; exp() underflows to exactly 0.0

# vector-slab row indices (must match pack_params ordering)
_R_N1W, _R_N1B, _R_N2W, _R_N2B, _R_N3W, _R_N3B = 0, 1, 2, 3, 4, 5
_R_SA_BQKV, _R_SA_BO, _R_CA_BQ, _R_CA_BKV, _R_CA_BO = 6, 7, 8, 9, 10
_VEC_ROWS = 11


# ----------------------------------------------------------------------------
# helpers shared by wrapper + kernel
# ----------------------------------------------------------------------------
def _w_offsets(D, kv_dim, F):
    """Column offsets of each fused weight inside the (D, total) weight slab."""
    o_qkv = 0                        # self-attn fused Wq|Wk|Wv   (D + 2*kv_dim)
    o_sao = o_qkv + D + 2 * kv_dim   # self-attn out_proj          (D)
    o_caq = o_sao + D                # cross-attn Wq               (D)
    o_gu = o_caq + D                 # MLP fused gate|up           (2F), 128-aligned here
    o_cakv = o_gu + 2 * F            # cross-attn fused Wk|Wv      (2*kv_dim)
    o_cao = o_cakv + 2 * kv_dim      # cross-attn out_proj         (D)
    total = o_cao + D
    return o_qkv, o_sao, o_caq, o_gu, o_cakv, o_cao, total


def _full_spec(shape):
    nd = len(shape)
    return pl.BlockSpec(shape, lambda i, _nd=nd: (0,) * _nd)


def _layernorm(x, w, b, eps=1e-5):
    mu = jnp.mean(x, axis=-1, keepdims=True)
    var = jnp.mean((x - mu) ** 2, axis=-1, keepdims=True)
    return (x - mu) * jax.lax.rsqrt(var + eps) * w + b


def _gqa_attention(q2d, k2d, v2d, *, bias, B, Sq, Sk, Hq, Hkv, dh,
                   exact_probs, return_probs):
    """All heads of scaled dot-product attention, GQA via a kv-group loop.

    q2d: (B*Sq, Hq*dh); k2d/v2d: (B*Sk, Hkv*dh);
    bias: (B, Hkv, n_rep*Sq, Sk) additive (ALiBi + causal pre-combined) or None.
    Returns:
      ctx   (B*Sq, Hq*dh)  -- ready for ONE fused out-projection matmul.
      probs (B*Sq, Hq*Sk)  -- lane-dense [b, q, h, k] order (or None).
    """
    n_rep = Hq // Hkv
    scale = 1.0 / math.sqrt(dh)
    q3 = q2d.reshape(B, Sq, Hq * dh)
    k3 = k2d.reshape(B, Sk, Hkv * dh)
    v3 = v2d.reshape(B, Sk, Hkv * dh)

    ctx_parts = [None] * Hq
    prob_parts = [None] * Hq
    for g in range(Hkv):                                   # static kv-group loop
        # The n_rep query heads of this group share k_g/v_g: stack their
        # queries along the row dim so QK^T and P@V are one wider batched
        # matmul per group instead of n_rep tiny ones (review #4).
        q_grp = jnp.concatenate(
            [q3[:, :, (g * n_rep + r) * dh:(g * n_rep + r + 1) * dh]
             for r in range(n_rep)], axis=1)               # (B, n_rep*Sq, dh)
        k_g = k3[:, :, g * dh:(g + 1) * dh]                # (B, Sk, dh)
        v_g = v3[:, :, g * dh:(g + 1) * dh]

        s = jnp.einsum("bqd,bkd->bqk", q_grp, k_g,
                       preferred_element_type=jnp.float32) * scale
        if bias is not None:
            s = s + bias[:, g]                             # causal+ALiBi folded in

        m = jnp.max(s, axis=-1, keepdims=True)
        e = jnp.exp(s - m)
        denom = jnp.sum(e, axis=-1, keepdims=True)
        if exact_probs:
            p = e / denom                                  # exact: probs are returned
        else:
            p = e * pl.reciprocal(denom, approx=True)      # EUP slot (~free)

        o = jnp.einsum("bqk,bkd->bqd", p, v_g,
                       preferred_element_type=jnp.float32)  # (B, n_rep*Sq, dh)

        for r in range(n_rep):
            h = g * n_rep + r
            rows = slice(r * Sq, (r + 1) * Sq)
            ctx_parts[h] = o[:, rows, :].reshape(B * Sq, dh)
            if return_probs:
                prob_parts[h] = p[:, rows, :].reshape(B * Sq, Sk)

    ctx = jnp.concatenate(ctx_parts, axis=-1)              # (B*Sq, Hq*dh) lane concat
    probs = jnp.concatenate(prob_parts, axis=-1) if return_probs else None
    return ctx, probs


# ----------------------------------------------------------------------------
# fused decoder-layer kernel (single grid point, everything in VMEM)
# ----------------------------------------------------------------------------
def _decoder_layer_kernel(*refs, B, S, Se, D, Hq, Hkv, F,
                          has_self_bias, has_cross_bias):
    it = iter(refs)
    x_ref, enc_ref = next(it), next(it)
    self_bias_ref = next(it) if has_self_bias else None
    cross_bias_ref = next(it) if has_cross_bias else None
    vec_ref, w_ref, wd_ref = next(it), next(it), next(it)
    out_ref, probs_ref = next(it), next(it)

    dh = D // Hq
    kv_dim = dh * Hkv

    vec = vec_ref[...]                 # (11, 64) packed vectors
    w = w_ref[...]                     # (D, 320) packed fan-in-D weights

    o_qkv, o_sao, o_caq, o_gu, o_cakv, o_cao, _ = _w_offsets(D, kv_dim, F)
    sa_wqkv = w[:, o_qkv:o_qkv + D + 2 * kv_dim]
    sa_wo = w[:, o_sao:o_sao + D]
    ca_wq = w[:, o_caq:o_caq + D]
    ffn_wgu = w[:, o_gu:o_gu + 2 * F]
    ca_wkv = w[:, o_cakv:o_cakv + 2 * kv_dim]
    ca_wo = w[:, o_cao:o_cao + D]

    n1w, n1b = vec[_R_N1W:_R_N1W + 1, :D], vec[_R_N1B:_R_N1B + 1, :D]
    n2w, n2b = vec[_R_N2W:_R_N2W + 1, :D], vec[_R_N2B:_R_N2B + 1, :D]
    n3w, n3b = vec[_R_N3W:_R_N3W + 1, :D], vec[_R_N3B:_R_N3B + 1, :D]
    sa_bqkv = vec[_R_SA_BQKV:_R_SA_BQKV + 1, :D + 2 * kv_dim]
    sa_bo = vec[_R_SA_BO:_R_SA_BO + 1, :D]
    ca_bq = vec[_R_CA_BQ:_R_CA_BQ + 1, :D]
    ca_bkv = vec[_R_CA_BKV:_R_CA_BKV + 1, :2 * kv_dim]
    ca_bo = vec[_R_CA_BO:_R_CA_BO + 1, :D]

    x = x_ref[...]                     # (B*S, D)
    enc = enc_ref[...]                 # (B*Se, D)

    # --- self attention block (pre-norm, causal, GQA, ALiBi) ---
    a = _layernorm(x, n1w, n1b)
    qkv = jnp.dot(a, sa_wqkv, preferred_element_type=jnp.float32) + sa_bqkv
    ctx, _ = _gqa_attention(
        qkv[:, :D], qkv[:, D:D + kv_dim], qkv[:, D + kv_dim:],
        bias=self_bias_ref[...] if has_self_bias else None,
        B=B, Sq=S, Sk=S, Hq=Hq, Hkv=Hkv, dh=dh,
        exact_probs=False, return_probs=False)         # self-attn probs unused
    # TODO(synk): dropout omitted (config.dropout_rate = 0.0 -> identity).
    x = x + jnp.dot(ctx, sa_wo, preferred_element_type=jnp.float32) + sa_bo

    # --- cross attention block (pre-norm, non-causal); probs are returned ---
    a = _layernorm(x, n2w, n2b)
    q = jnp.dot(a, ca_wq, preferred_element_type=jnp.float32) + ca_bq
    kv = jnp.dot(enc, ca_wkv, preferred_element_type=jnp.float32) + ca_bkv
    ctx, probs = _gqa_attention(
        q, kv[:, :kv_dim], kv[:, kv_dim:],
        bias=cross_bias_ref[...] if has_cross_bias else None,
        B=B, Sq=S, Sk=Se, Hq=Hq, Hkv=Hkv, dh=dh,
        exact_probs=True, return_probs=True)
    probs_ref[...] = probs                             # (B*S, Hq*Se) lane-dense
    x = x + jnp.dot(ctx, ca_wo, preferred_element_type=jnp.float32) + ca_bo

    # --- LlamaMLP block (fused gate+up matmul, SiLU, down proj) ---
    m = _layernorm(x, n3w, n3b)
    gu = jnp.dot(m, ffn_wgu, preferred_element_type=jnp.float32)
    g = gu[:, :F]
    u = gu[:, F:]
    x = x + jnp.dot(g * jax.nn.sigmoid(g) * u, wd_ref[...],
                    preferred_element_type=jnp.float32)

    out_ref[...] = x


# ----------------------------------------------------------------------------
# wrapper
# ----------------------------------------------------------------------------
def _combined_bias(bias, B, Hq, Hkv, Sq, Sk, causal):
    """Additive attention bias with the causal mask pre-folded in (review #5).

    Output shape (B, Hkv, n_rep*Sq, Sk): exactly the layout the kernel's
    kv-group loop adds to its scores.  Batch-dependent biases are supported.
    """
    apply_causal = causal and Sq > 1
    if bias is None and not apply_causal:
        return None
    add = jnp.zeros((1, 1, Sq, Sk), jnp.float32)
    if bias is not None:
        b = jnp.asarray(bias, jnp.float32)
        if b.ndim < 4:
            b = b.reshape((1,) * (4 - b.ndim) + b.shape)
        b = b[:, :, max(0, b.shape[2] - Sq):, max(0, b.shape[3] - Sk):]
        add = add + b
    if apply_causal:
        row = jnp.arange(Sq, dtype=jnp.int32)[:, None]
        col = jnp.arange(Sk, dtype=jnp.int32)[None, :]
        add = add + jnp.where(col > row + (Sk - Sq), _MASK, 0.0)
    n_rep = Hq // Hkv
    return jnp.broadcast_to(add, (B, Hq, Sq, Sk)).reshape(B, Hkv, n_rep * Sq, Sk)


@functools.partial(jax.jit, static_argnames=("q_heads", "kv_heads"))
def transformer_decoder_layer(packed, x, enc_outputs,
                              self_attn_bias=None, cross_attn_bias=None,
                              q_heads=4, kv_heads=2):
    B, S, D = x.shape
    Se = enc_outputs.shape[1]
    assert D % q_heads == 0 and q_heads % kv_heads == 0
    dh = D // q_heads
    kv_dim = dh * kv_heads
    F = packed["wd"].shape[0]

    self_bias = _combined_bias(self_attn_bias, B, q_heads, kv_heads, S, S, True)
    cross_bias = _combined_bias(cross_attn_bias, B, q_heads, kv_heads, S, Se, False)
    has_self_bias = self_bias is not None
    has_cross_bias = cross_bias is not None

    inputs = [x.reshape(B * S, D), enc_outputs.reshape(B * Se, D)]
    if has_self_bias:
        inputs.append(self_bias)
    if has_cross_bias:
        inputs.append(cross_bias)
    inputs += [packed["vec"], packed["w"], packed["wd"]]

    out_shapes = [
        jax.ShapeDtypeStruct((B * S, D), jnp.float32),             # layer output
        jax.ShapeDtypeStruct((B * S, q_heads * Se), jnp.float32),  # cross-attn probs
    ]

    # advisory cost estimate for XLA's scheduler
    flops = 2 * B * S * D * (D + 2 * kv_dim)                 # fused self QKV
    flops += 2 * 2 * B * q_heads * S * S * dh                # self-attn matmuls
    flops += 2 * B * S * D * D                               # self out-proj
    flops += 2 * B * S * D * D + 2 * B * Se * D * (2 * kv_dim)   # cross Q / KV
    flops += 2 * 2 * B * q_heads * S * Se * dh               # cross-attn matmuls
    flops += 2 * B * S * D * D                               # cross out-proj
    flops += 2 * B * S * D * (2 * F) + 2 * B * S * F * D     # LlamaMLP
    transcendentals = B * q_heads * S * (S + Se) + B * S * F
    bytes_accessed = sum(int(math.prod(t.shape)) * 4 for t in inputs)
    bytes_accessed += sum(int(math.prod(s.shape)) * 4 for s in out_shapes)

    kernel = functools.partial(
        _decoder_layer_kernel,
        B=B, S=S, Se=Se, D=D, Hq=q_heads, Hkv=kv_heads, F=F,
        has_self_bias=has_self_bias, has_cross_bias=has_cross_bias)

    # TODO(synk): on v7x, grid over batch with dimension_semantics=('parallel',)
    # would use the second TensorCore once B/S grow beyond toy sizes.
    out2d, probs2d = pl.pallas_call(
        kernel,
        grid=(1,),
        in_specs=[_full_spec(t.shape) for t in inputs],
        out_specs=[_full_spec(s.shape) for s in out_shapes],
        out_shape=out_shapes,
        compiler_params=pltpu.CompilerParams(dimension_semantics=("arbitrary",)),
        cost_estimate=pl.CostEstimate(flops=flops,
                                      transcendentals=transcendentals,
                                      bytes_accessed=bytes_accessed),
    )(*inputs)

    probs = probs2d.reshape(B, S, q_heads, Se).transpose(0, 2, 1, 3)
    return out2d.reshape(B, S, D), probs


# ----------------------------------------------------------------------------
# Parameter init + one-time packing (reviews #1 / #6)
# ----------------------------------------------------------------------------
def init_params(key, d_model, q_heads, kv_heads, ff_dim):
    dh = d_model // q_heads
    kv_dim = dh * kv_heads
    keys = jax.random.split(key, 16)

    def lin(k, fan_in, fan_out, bias=True):
        w = 0.05 * jax.random.normal(k, (fan_in, fan_out), jnp.float32)
        b = (0.02 * jax.random.normal(jax.random.fold_in(k, 1), (fan_out,), jnp.float32)
             if bias else None)
        return w, b

    p = {}
    for n, kk in zip(("norm1", "norm2", "norm3"), keys[:3]):
        p[n + "_w"] = jnp.ones((d_model,), jnp.float32) + 0.01 * jax.random.normal(
            kk, (d_model,), jnp.float32)
        p[n + "_b"] = 0.01 * jax.random.normal(
            jax.random.fold_in(kk, 7), (d_model,), jnp.float32)
    p["sa_wq"], p["sa_bq"] = lin(keys[3], d_model, d_model)
    p["sa_wk"], p["sa_bk"] = lin(keys[4], d_model, kv_dim)
    p["sa_wv"], p["sa_bv"] = lin(keys[5], d_model, kv_dim)
    p["sa_wo"], p["sa_bo"] = lin(keys[6], d_model, d_model)
    p["ca_wq"], p["ca_bq"] = lin(keys[7], d_model, d_model)
    p["ca_wk"], p["ca_bk"] = lin(keys[8], d_model, kv_dim)
    p["ca_wv"], p["ca_bv"] = lin(keys[9], d_model, kv_dim)
    p["ca_wo"], p["ca_bo"] = lin(keys[10], d_model, d_model)
    p["ffn_wg"], _ = lin(keys[11], d_model, ff_dim, bias=False)
    p["ffn_wu"], _ = lin(keys[12], d_model, ff_dim, bias=False)
    p["ffn_wd"], _ = lin(keys[13], ff_dim, d_model, bias=False)
    return p


def pack_params(params):
    """Pack all layer parameters into 3 dense f32 slabs, once, at init time."""
    D = params["norm1_w"].shape[0]
    kv_dim = params["sa_wk"].shape[1]
    F = params["ffn_wg"].shape[1]
    width = D + 2 * kv_dim            # widest vector row = fused self-QKV bias

    def row(v):
        v = jnp.asarray(v, jnp.float32).reshape(-1)
        return jnp.pad(v, (0, width - v.shape[0]))[None, :]

    vec = jnp.concatenate([
        row(params["norm1_w"]), row(params["norm1_b"]),
        row(params["norm2_w"]), row(params["norm2_b"]),
        row(params["norm3_w"]), row(params["norm3_b"]),
        row(jnp.concatenate([params["sa_bq"], params["sa_bk"], params["sa_bv"]])),
        row(params["sa_bo"]),
        row(params["ca_bq"]),
        row(jnp.concatenate([params["ca_bk"], params["ca_bv"]])),
        row(params["ca_bo"]),
    ], axis=0)                                               # (_VEC_ROWS, width)

    w_slab = jnp.concatenate([
        params["sa_wq"], params["sa_wk"], params["sa_wv"],   # fused self QKV
        params["sa_wo"],
        params["ca_wq"],
        params["ffn_wg"], params["ffn_wu"],                  # fused gate|up
        params["ca_wk"], params["ca_wv"],                    # fused cross KV
        params["ca_wo"],
    ], axis=1)                                               # (D, total)

    total = _w_offsets(D, kv_dim, F)[-1]
    assert w_slab.shape == (D, total), (w_slab.shape, total)
    assert vec.shape == (_VEC_ROWS, width)
    return {"vec": vec, "w": w_slab, "wd": jnp.asarray(params["ffn_wd"], jnp.float32)}


def build_alibi_bias(n_heads, seq_len):
    # ALiBi-style attn_bias with shape (1, H, 1, Sk)
    m = jnp.arange(1, n_heads + 1, dtype=jnp.float32)
    slopes = 2.0 ** (-8.0 * m / n_heads)
    dist = -(seq_len - 1 - jnp.arange(seq_len, dtype=jnp.float32))
    return slopes[None, :, None, None] * dist[None, None, None, :]


# ----------------------------------------------------------------------------
# Pure-JAX reference for sanity check (mirrors the torch module)
# ----------------------------------------------------------------------------
def reference_forward(p, x, enc, self_bias, cross_bias, q_heads, kv_heads):
    def ln(t, w, b, eps=1e-5):
        mu = t.mean(-1, keepdims=True)
        var = ((t - mu) ** 2).mean(-1, keepdims=True)
        return (t - mu) / jnp.sqrt(var + eps) * w + b

    def attn(q, k, v, bias, causal):
        B, Sq, D = q.shape
        dh = D // q_heads
        Sk = k.shape[1]
        qh = q.reshape(B, Sq, q_heads, dh).transpose(0, 2, 1, 3)
        kh = k.reshape(B, Sk, kv_heads, dh).transpose(0, 2, 1, 3)
        vh = v.reshape(B, Sk, kv_heads, dh).transpose(0, 2, 1, 3)
        rep = q_heads // kv_heads
        kh = jnp.repeat(kh, rep, axis=1)
        vh = jnp.repeat(vh, rep, axis=1)
        s = jnp.einsum("bhqd,bhkd->bhqk", qh, kh) * (1.0 / math.sqrt(dh))
        if bias is not None:
            s = s + bias
        if causal and Sq > 1:
            row = jnp.arange(Sq)[:, None]
            col = jnp.arange(Sk)[None, :]
            s = jnp.where(col > row + (Sk - Sq), F32_MIN, s)
        pr = jax.nn.softmax(s, axis=-1)
        o = jnp.einsum("bhqk,bhkd->bhqd", pr, vh)
        return o.transpose(0, 2, 1, 3).reshape(B, Sq, D), pr

    a = ln(x, p["norm1_w"], p["norm1_b"])
    ctx, _ = attn(a @ p["sa_wq"] + p["sa_bq"], a @ p["sa_wk"] + p["sa_bk"],
                  a @ p["sa_wv"] + p["sa_bv"], self_bias, True)
    x = x + ctx @ p["sa_wo"] + p["sa_bo"]

    a = ln(x, p["norm2_w"], p["norm2_b"])
    ctx, w = attn(a @ p["ca_wq"] + p["ca_bq"], enc @ p["ca_wk"] + p["ca_bk"],
                  enc @ p["ca_wv"] + p["ca_bv"], cross_bias, False)
    x = x + ctx @ p["ca_wo"] + p["ca_bo"]

    m = ln(x, p["norm3_w"], p["norm3_b"])
    g = m @ p["ffn_wg"]
    g = g * jax.nn.sigmoid(g)
    x = x + (g * (m @ p["ffn_wu"])) @ p["ffn_wd"]
    return x, w


# ----------------------------------------------------------------------------
if __name__ == "__main__":
    B, S, Se, D, Hq, Hkv, FF = 2, 8, 8, 32, 4, 2, 64
    key = jax.random.PRNGKey(0)
    kx, ke, kp = jax.random.split(key, 3)
    x = jax.random.normal(kx, (B, S, D), jnp.float32)
    enc = jax.random.normal(ke, (B, Se, D), jnp.float32)
    params = init_params(kp, D, Hq, Hkv, FF)
    packed = pack_params(params)            # one-time slab packing (reviews #1/#6)
    self_bias = build_alibi_bias(Hq, S)     # (1, H, 1, S) ALiBi bias for self-attn

    out, attn_w = transformer_decoder_layer(
        packed, x, enc, self_attn_bias=self_bias, cross_attn_bias=None,
        q_heads=Hq, kv_heads=Hkv,
    )
    jax.block_until_ready((out, attn_w))

    ref_out, ref_w = reference_forward(params, x, enc, self_bias, None, Hq, Hkv)
    assert out.shape == (B, S, D) and attn_w.shape == (B, Hq, S, Se)
    # tolerance covers the EUP approximate reciprocal on the self-attn path
    assert jnp.allclose(out, ref_out, atol=3e-3, rtol=3e-3), "output mismatch"
    assert jnp.allclose(attn_w, ref_w, atol=3e-3, rtol=3e-3), "attn weights mismatch"
    print("KERNEL_OK")
</pallas_src>

<mosaic_0001>
module attributes {stable_mosaic.version = 11 : i64} {
  func.func @_decoder_layer_kernel(%arg0: i32, %arg1: memref<16x32xf32, #tpu.memory_space<vmem>>, %arg2: memref<16x32xf32, #tpu.memory_space<vmem>>, %arg3: memref<2x2x16x8xf32, #tpu.memory_space<vmem>>, %arg4: memref<11x64xf32, #tpu.memory_space<vmem>>, %arg5: memref<32x320xf32, #tpu.memory_space<vmem>>, %arg6: memref<64x32xf32, #tpu.memory_space<vmem>>, %arg7: memref<16x32xf32, #tpu.memory_space<vmem>>, %arg8: memref<16x32xf32, #tpu.memory_space<vmem>>) attributes {dimension_semantics = [#tpu.dimension_semantics<arbitrary>], iteration_bounds = array<i64: 1>, scalar_prefetch = 0 : i64, scratch_operands = 0 : i64, tpu.core_type = #tpu.core_type<tc>, window_params = [{pipeline_mode = #tpu.pipeline_mode<synchronous>, transform_indices = @transform_0, window_bounds = array<i64: 16, 32>}, {pipeline_mode = #tpu.pipeline_mode<synchronous>, transform_indices = @transform_1, window_bounds = array<i64: 16, 32>}, {pipeline_mode = #tpu.pipeline_mode<synchronous>, transform_indices = @transform_2, window_bounds = array<i64: 2, 2, 16, 8>}, {pipeline_mode = #tpu.pipeline_mode<synchronous>, transform_indices = @transform_3, window_bounds = array<i64: 11, 64>}, {pipeline_mode = #tpu.pipeline_mode<synchronous>, transform_indices = @transform_4, window_bounds = array<i64: 32, 320>}, {pipeline_mode = #tpu.pipeline_mode<synchronous>, transform_indices = @transform_5, window_bounds = array<i64: 64, 32>}, {pipeline_mode = #tpu.pipeline_mode<synchronous>, transform_indices = @transform_6, window_bounds = array<i64: 16, 32>}, {pipeline_mode = #tpu.pipeline_mode<synchronous>, transform_indices = @transform_7, window_bounds = array<i64: 16, 32>}]} {
    %c0 = arith.constant 0 : index
    %c0_0 = arith.constant 0 : index
    %0 = vector.load %arg4[%c0, %c0_0] : memref<11x64xf32, #tpu.memory_space<vmem>>, vector<11x64xf32>
    %c0_1 = arith.constant 0 : index
    %c0_2 = arith.constant 0 : index
    %1 = vector.load %arg5[%c0_1, %c0_2] : memref<32x320xf32, #tpu.memory_space<vmem>>, vector<32x320xf32>
    %2 = vector.extract_strided_slice %1 {offsets = [0, 0], sizes = [32, 64], strides = [1, 1]} : vector<32x320xf32> to vector<32x64xf32>
    %3 = vector.extract_strided_slice %1 {offsets = [0, 64], sizes = [32, 32], strides = [1, 1]} : vector<32x320xf32> to vector<32x32xf32>
    %4 = vector.extract_strided_slice %1 {offsets = [0, 96], sizes = [32, 32], strides = [1, 1]} : vector<32x320xf32> to vector<32x32xf32>
    %5 = vector.extract_strided_slice %1 {offsets = [0, 128], sizes = [32, 128], strides = [1, 1]} : vector<32x320xf32> to vector<32x128xf32>
    %6 = vector.extract_strided_slice %1 {offsets = [0, 256], sizes = [32, 32], strides = [1, 1]} : vector<32x320xf32> to vector<32x32xf32>
    %7 = vector.extract_strided_slice %1 {offsets = [0, 288], sizes = [32, 32], strides = [1, 1]} : vector<32x320xf32> to vector<32x32xf32>
    %8 = vector.extract_strided_slice %0 {offsets = [0, 0], sizes = [1, 32], strides = [1, 1]} : vector<11x64xf32> to vector<1x32xf32>
    %9 = vector.extract_strided_slice %0 {offsets = [1, 0], sizes = [1, 32], strides = [1, 1]} : vector<11x64xf32> to vector<1x32xf32>
    %10 = vector.extract_strided_slice %0 {offsets = [2, 0], sizes = [1, 32], strides = [1, 1]} : vector<11x64xf32> to vector<1x32xf32>
    %11 = vector.extract_strided_slice %0 {offsets = [3, 0], sizes = [1, 32], strides = [1, 1]} : vector<11x64xf32> to vector<1x32xf32>
    %12 = vector.extract_strided_slice %0 {offsets = [4, 0], sizes = [1, 32], strides = [1, 1]} : vector<11x64xf32> to vector<1x32xf32>
    %13 = vector.extract_strided_slice %0 {offsets = [5, 0], sizes = [1, 32], strides = [1, 1]} : vector<11x64xf32> to vector<1x32xf32>
    %14 = vector.extract_strided_slice %0 {offsets = [6, 0], sizes = [1, 64], strides = [1, 1]} : vector<11x64xf32> to vector<1x64xf32>
    %15 = vector.extract_strided_slice %0 {offsets = [7, 0], sizes = [1, 32], strides = [1, 1]} : vector<11x64xf32> to vector<1x32xf32>
    %16 = vector.extract_strided_slice %0 {offsets = [8, 0], sizes = [1, 32], strides = [1, 1]} : vector<11x64xf32> to vector<1x32xf32>
    %17 = vector.extract_strided_slice %0 {offsets = [9, 0], sizes = [1, 32], strides = [1, 1]} : vector<11x64xf32> to vector<1x32xf32>
    %18 = vector.extract_strided_slice %0 {offsets = [10, 0], sizes = [1, 32], strides = [1, 1]} : vector<11x64xf32> to vector<1x32xf32>
    %c0_3 = arith.constant 0 : index
    %c0_4 = arith.constant 0 : index
    %19 = vector.load %arg1[%c0_3, %c0_4] : memref<16x32xf32, #tpu.memory_space<vmem>>, vector<16x32xf32>
    %c0_5 = arith.constant 0 : index
    %c0_6 = arith.constant 0 : index
    %20 = vector.load %arg2[%c0_5, %c0_6] : memref<16x32xf32, #tpu.memory_space<vmem>>, vector<16x32xf32>
    %cst = arith.constant dense<0.000000e+00> : vector<16xf32>
    %21 = vector.multi_reduction <add>, %19, %cst [1] : vector<16x32xf32> to vector<16xf32>
    %22 = vector.shape_cast %21 : vector<16xf32> to vector<16x1xf32>
    %cst_7 = arith.constant 3.200000e+01 : f32
    %23 = vector.broadcast %cst_7 : f32 to vector<16x1xf32>
    %24 = arith.divf %22, %23 : vector<16x1xf32>
    %25 = vector.broadcast %24 : vector<16x1xf32> to vector<16x32xf32>
    %26 = arith.subf %19, %25 : vector<16x32xf32>
    %27 = arith.mulf %26, %26 : vector<16x32xf32>
    %cst_8 = arith.constant dense<0.000000e+00> : vector<16xf32>
    %28 = vector.multi_reduction <add>, %27, %cst_8 [1] : vector<16x32xf32> to vector<16xf32>
    %29 = vector.shape_cast %28 : vector<16xf32> to vector<16x1xf32>
    %cst_9 = arith.constant 3.200000e+01 : f32
    %30 = vector.broadcast %cst_9 : f32 to vector<16x1xf32>
    %31 = arith.divf %29, %30 : vector<16x1xf32>
    %32 = vector.broadcast %24 : vector<16x1xf32> to vector<16x32xf32>
    %33 = arith.subf %19, %32 : vector<16x32xf32>
    %cst_10 = arith.constant 9.99999974E-6 : f32
    %34 = vector.broadcast %cst_10 : f32 to vector<16x1xf32>
    %35 = arith.addf %31, %34 : vector<16x1xf32>
    %36 = math.rsqrt %35 : vector<16x1xf32>
    %37 = vector.broadcast %36 : vector<16x1xf32> to vector<16x32xf32>
    %38 = arith.mulf %33, %37 : vector<16x32xf32>
    %39 = vector.broadcast %8 : vector<1x32xf32> to vector<16x32xf32>
    %40 = arith.mulf %38, %39 : vector<16x32xf32>
    %41 = vector.broadcast %9 : vector<1x32xf32> to vector<16x32xf32>
    %42 = arith.addf %40, %41 : vector<16x32xf32>
    %cst_11 = arith.constant dense<0.000000e+00> : vector<16x64xf32>
    %43 = tpu.matmul %42, %2, %cst_11 {dimension_numbers = #tpu.dot_dimension_numbers<[1], [0], [0], [1], [0, 0, 1, 1], [], []>} : vector<16x32xf32>, vector<32x64xf32>, vector<16x64xf32> -> vector<16x64xf32>
    %44 = vector.broadcast %14 : vector<1x64xf32> to vector<16x64xf32>
    %45 = arith.addf %43, %44 : vector<16x64xf32>
    %46 = vector.extract_strided_slice %45 {offsets = [0, 0], sizes = [16, 32], strides = [1, 1]} : vector<16x64xf32> to vector<16x32xf32>
    %47 = vector.extract_strided_slice %45 {offsets = [0, 32], sizes = [16, 16], strides = [1, 1]} : vector<16x64xf32> to vector<16x16xf32>
    %48 = vector.extract_strided_slice %45 {offsets = [0, 48], sizes = [16, 16], strides = [1, 1]} : vector<16x64xf32> to vector<16x16xf32>
    %c0_12 = arith.constant 0 : index
    %c0_13 = arith.constant 0 : index
    %c0_14 = arith.constant 0 : index
    %c0_15 = arith.constant 0 : index
    %49 = vector.load %arg3[%c0_12, %c0_13, %c0_14, %c0_15] : memref<2x2x16x8xf32, #tpu.memory_space<vmem>>, vector<2x2x16x8xf32>
    %50 = vector.shape_cast %46 : vector<16x32xf32> to vector<2x8x32xf32>
    %51 = vector.shape_cast %47 : vector<16x16xf32> to vector<2x8x16xf32>
    %52 = vector.shape_cast %48 : vector<16x16xf32> to vector<2x8x16xf32>
    %53 = vector.extract_strided_slice %50 {offsets = [0, 0, 0], sizes = [2, 8, 8], strides = [1, 1, 1]} : vector<2x8x32xf32> to vector<2x8x8xf32>
    %54 = vector.extract_strided_slice %50 {offsets = [0, 0, 8], sizes = [2, 8, 8], strides = [1, 1, 1]} : vector<2x8x32xf32> to vector<2x8x8xf32>
    %55 = tpu.concatenate %53, %54 in 1 : vector<2x8x8xf32>, vector<2x8x8xf32> -> vector<2x16x8xf32>
    %56 = vector.extract_strided_slice %51 {offsets = [0, 0, 0], sizes = [2, 8, 8], strides = [1, 1, 1]} : vector<2x8x16xf32> to vector<2x8x8xf32>
    %57 = vector.extract_strided_slice %52 {offsets = [0, 0, 0], sizes = [2, 8, 8], strides = [1, 1, 1]} : vector<2x8x16xf32> to vector<2x8x8xf32>
    "tpu.trace_start"() <{level = 10 : i32, message = "bqd,bkd->bqk"}> : () -> ()
    %cst_16 = arith.constant dense<0.000000e+00> : vector<2x16x8xf32>
    %58 = tpu.matmul %55, %56, %cst_16 {dimension_numbers = #tpu.dot_dimension_numbers<[2], [2], [1], [1], [0, 0, 0, 1, 1, 1], [0], [0]>} : vector<2x16x8xf32>, vector<2x8x8xf32>, vector<2x16x8xf32> -> vector<2x16x8xf32>
    "tpu.trace_stop"() : () -> ()
    %cst_17 = arith.constant 0.353553385 : f32
    %59 = vector.broadcast %cst_17 : f32 to vector<2x16x8xf32>
    %60 = arith.mulf %58, %59 : vector<2x16x8xf32>
    %61 = vector.extract_strided_slice %49 {offsets = [0, 0, 0, 0], sizes = [2, 1, 16, 8], strides = [1, 1, 1, 1]} : vector<2x2x16x8xf32> to vector<2x1x16x8xf32>
    %62 = vector.shape_cast %61 : vector<2x1x16x8xf32> to vector<2x16x8xf32>
    %63 = arith.addf %60, %62 : vector<2x16x8xf32>
    %cst_18 = arith.constant dense<0xFF800000> : vector<2x16xf32>
    %64 = vector.multi_reduction <maximumf>, %63, %cst_18 [2] : vector<2x16x8xf32> to vector<2x16xf32>
    %65 = vector.shape_cast %64 : vector<2x16xf32> to vector<2x16x1xf32>
    %66 = vector.broadcast %65 : vector<2x16x1xf32> to vector<2x16x8xf32>
    %67 = arith.subf %63, %66 : vector<2x16x8xf32>
    %68 = math.exp %67 : vector<2x16x8xf32>
    %cst_19 = arith.constant dense<0.000000e+00> : vector<2x16xf32>
    %69 = vector.multi_reduction <add>, %68, %cst_19 [2] : vector<2x16x8xf32> to vector<2x16xf32>
    %70 = vector.shape_cast %69 : vector<2x16xf32> to vector<2x16x1xf32>
    %71 = tpu.reciprocal %70 {approx = true} : vector<2x16x1xf32> -> vector<2x16x1xf32>
    %72 = vector.broadcast %71 : vector<2x16x1xf32> to vector<2x16x8xf32>
    %73 = arith.mulf %68, %72 : vector<2x16x8xf32>
    "tpu.trace_start"() <{level = 10 : i32, message = "bqk,bkd->bqd"}> : () -> ()
    %cst_20 = arith.constant dense<0.000000e+00> : vector<2x16x8xf32>
    %74 = tpu.matmul %73, %57, %cst_20 {dimension_numbers = #tpu.dot_dimension_numbers<[2], [1], [1], [2], [0, 0, 0, 1, 1, 2], [0], [0]>} : vector<2x16x8xf32>, vector<2x8x8xf32>, vector<2x16x8xf32> -> vector<2x16x8xf32>
    "tpu.trace_stop"() : () -> ()
    %75 = vector.extract_strided_slice %74 {offsets = [0, 0, 0], sizes = [2, 8, 8], strides = [1, 1, 1]} : vector<2x16x8xf32> to vector<2x8x8xf32>
    %76 = vector.shape_cast %75 : vector<2x8x8xf32> to vector<16x8xf32>
    %77 = vector.extract_strided_slice %74 {offsets = [0, 8, 0], sizes = [2, 8, 8], strides = [1, 1, 1]} : vector<2x16x8xf32> to vector<2x8x8xf32>
    %78 = vector.shape_cast %77 : vector<2x8x8xf32> to vector<16x8xf32>
    %79 = vector.extract_strided_slice %50 {offsets = [0, 0, 16], sizes = [2, 8, 8], strides = [1, 1, 1]} : vector<2x8x32xf32> to vector<2x8x8xf32>
    %80 = vector.extract_strided_slice %50 {offsets = [0, 0, 24], sizes = [2, 8, 8], strides = [1, 1, 1]} : vector<2x8x32xf32> to vector<2x8x8xf32>
    %81 = tpu.concatenate %79, %80 in 1 : vector<2x8x8xf32>, vector<2x8x8xf32> -> vector<2x16x8xf32>
    %82 = vector.extract_strided_slice %51 {offsets = [0, 0, 8], sizes = [2, 8, 8], strides = [1, 1, 1]} : vector<2x8x16xf32> to vector<2x8x8xf32>
    %83 = vector.extract_strided_slice %52 {offsets = [0, 0, 8], sizes = [2, 8, 8], strides = [1, 1, 1]} : vector<2x8x16xf32> to vector<2x8x8xf32>
    "tpu.trace_start"() <{level = 10 : i32, message = "bqd,bkd->bqk"}> : () -> ()
    %cst_21 = arith.constant dense<0.000000e+00> : vector<2x16x8xf32>
    %84 = tpu.matmul %81, %82, %cst_21 {dimension_numbers = #tpu.dot_dimension_numbers<[2], [2], [1], [1], [0, 0, 0, 1, 1, 1], [0], [0]>} : vector<2x16x8xf32>, vector<2x8x8xf32>, vector<2x16x8xf32> -> vector<2x16x8xf32>
    "tpu.trace_stop"() : () -> ()
    %cst_22 = arith.constant 0.353553385 : f32
    %85 = vector.broadcast %cst_22 : f32 to vector<2x16x8xf32>
    %86 = arith.mulf %84, %85 : vector<2x16x8xf32>
    %87 = vector.extract_strided_slice %49 {offsets = [0, 1, 0, 0], sizes = [2, 1, 16, 8], strides = [1, 1, 1, 1]} : vector<2x2x16x8xf32> to vector<2x1x16x8xf32>
    %88 = vector.shape_cast %87 : vector<2x1x16x8xf32> to vector<2x16x8xf32>
    %89 = arith.addf %86, %88 : vector<2x16x8xf32>
    %cst_23 = arith.constant dense<0xFF800000> : vector<2x16xf32>
    %90 = vector.multi_reduction <maximumf>, %89, %cst_23 [2] : vector<2x16x8xf32> to vector<2x16xf32>
    %91 = vector.shape_cast %90 : vector<2x16xf32> to vector<2x16x1xf32>
    %92 = vector.broadcast %91 : vector<2x16x1xf32> to vector<2x16x8xf32>
    %93 = arith.subf %89, %92 : vector<2x16x8xf32>
    %94 = math.exp %93 : vector<2x16x8xf32>
    %cst_24 = arith.constant dense<0.000000e+00> : vector<2x16xf32>
    %95 = vector.multi_reduction <add>, %94, %cst_24 [2] : vector<2x16x8xf32> to vector<2x16xf32>
    %96 = vector.shape_cast %95 : vector<2x16xf32> to vector<2x16x1xf32>
    %97 = tpu.reciprocal %96 {approx = true} : vector<2x16x1xf32> -> vector<2x16x1xf32>
    %98 = vector.broadcast %97 : vector<2x16x1xf32> to vector<2x16x8xf32>
    %99 = arith.mulf %94, %98 : vector<2x16x8xf32>
    "tpu.trace_start"() <{level = 10 : i32, message = "bqk,bkd->bqd"}> : () -> ()
    %cst_25 = arith.constant dense<0.000000e+00> : vector<2x16x8xf32>
    %100 = tpu.matmul %99, %83, %cst_25 {dimension_numbers = #tpu.dot_dimension_numbers<[2], [1], [1], [2], [0, 0, 0, 1, 1, 2], [0], [0]>} : vector<2x16x8xf32>, vector<2x8x8xf32>, vector<2x16x8xf32> -> vector<2x16x8xf32>
    "tpu.trace_stop"() : () -> ()
    %101 = vector.extract_strided_slice %100 {offsets = [0, 0, 0], sizes = [2, 8, 8], strides = [1, 1, 1]} : vector<2x16x8xf32> to vector<2x8x8xf32>
    %102 = vector.shape_cast %101 : vector<2x8x8xf32> to vector<16x8xf32>
    %103 = vector.extract_strided_slice %100 {offsets = [0, 8, 0], sizes = [2, 8, 8], strides = [1, 1, 1]} : vector<2x16x8xf32> to vector<2x8x8xf32>
    %104 = vector.shape_cast %103 : vector<2x8x8xf32> to vector<16x8xf32>
    %105 = tpu.concatenate %76, %78, %102, %104 in 1 : vector<16x8xf32>, vector<16x8xf32>, vector<16x8xf32>, vector<16x8xf32> -> vector<16x32xf32>
    %cst_26 = arith.constant dense<0.000000e+00> : vector<16x32xf32>
    %106 = tpu.matmul %105, %3, %cst_26 {dimension_numbers = #tpu.dot_dimension_numbers<[1], [0], [0], [1], [0, 0, 1, 1], [], []>} : vector<16x32xf32>, vector<32x32xf32>, vector<16x32xf32> -> vector<16x32xf32>
    %107 = arith.addf %19, %106 : vector<16x32xf32>
    %108 = vector.broadcast %15 : vector<1x32xf32> to vector<16x32xf32>
    %109 = arith.addf %107, %108 : vector<16x32xf32>
    %cst_27 = arith.constant dense<0.000000e+00> : vector<16xf32>
    %110 = vector.multi_reduction <add>, %109, %cst_27 [1] : vector<16x32xf32> to vector<16xf32>
    %111 = vector.shape_cast %110 : vector<16xf32> to vector<16x1xf32>
    %cst_28 = arith.constant 3.200000e+01 : f32
    %112 = vector.broadcast %cst_28 : f32 to vector<16x1xf32>
    %113 = arith.divf %111, %112 : vector<16x1xf32>
    %114 = vector.broadcast %113 : vector<16x1xf32> to vector<16x32xf32>
    %115 = arith.subf %109, %114 : vector<16x32xf32>
    %116 = arith.mulf %115, %115 : vector<16x32xf32>
    %cst_29 = arith.constant dense<0.000000e+00> : vector<16xf32>
    %117 = vector.multi_reduction <add>, %116, %cst_29 [1] : vector<16x32xf32> to vector<16xf32>
    %118 = vector.shape_cast %117 : vector<16xf32> to vector<16x1xf32>
    %cst_30 = arith.constant 3.200000e+01 : f32
    %119 = vector.broadcast %cst_30 : f32 to vector<16x1xf32>
    %120 = arith.divf %118, %119 : vector<16x1xf32>
    %121 = vector.broadcast %113 : vector<16x1xf32> to vector<16x32xf32>
    %122 = arith.subf %109, %121 : vector<16x32xf32>
    %cst_31 = arith.constant 9.99999974E-6 : f32
    %123 = vector.broadcast %cst_31 : f32 to vector<16x1xf32>
    %124 = arith.addf %120, %123 : vector<16x1xf32>
    %125 = math.rsqrt %124 : vector<16x1xf32>
    %126 = vector.broadcast %125 : vector<16x1xf32> to vector<16x32xf32>
    %127 = arith.mulf %122, %126 : vector<16x32xf32>
    %128 = vector.broadcast %10 : vector<1x32xf32> to vector<16x32xf32>
    %129 = arith.mulf %127, %128 : vector<16x32xf32>
    %130 = vector.broadcast %11 : vector<1x32xf32> to vector<16x32xf32>
    %131 = arith.addf %129, %130 : vector<16x32xf32>
    %cst_32 = arith.constant dense<0.000000e+00> : vector<16x32xf32>
    %132 = tpu.matmul %131, %4, %cst_32 {dimension_numbers = #tpu.dot_dimension_numbers<[1], [0], [0], [1], [0, 0, 1, 1], [], []>} : vector<16x32xf32>, vector<32x32xf32>, vector<16x32xf32> -> vector<16x32xf32>
    %133 = vector.broadcast %16 : vector<1x32xf32> to vector<16x32xf32>
    %134 = arith.addf %132, %133 : vector<16x32xf32>
    %cst_33 = arith.constant dense<0.000000e+00> : vector<16x32xf32>
    %135 = tpu.matmul %20, %6, %cst_33 {dimension_numbers = #tpu.dot_dimension_numbers<[1], [0], [0], [1], [0, 0, 1, 1], [], []>} : vector<16x32xf32>, vector<32x32xf32>, vector<16x32xf32> -> vector<16x32xf32>
    %136 = vector.broadcast %17 : vector<1x32xf32> to vector<16x32xf32>
    %137 = arith.addf %135, %136 : vector<16x32xf32>
    %138 = vector.extract_strided_slice %137 {offsets = [0, 0], sizes = [16, 16], strides = [1, 1]} : vector<16x32xf32> to vector<16x16xf32>
    %139 = vector.extract_strided_slice %137 {offsets = [0, 16], sizes = [16, 16], strides = [1, 1]} : vector<16x32xf32> to vector<16x16xf32>
    %140 = vector.shape_cast %134 : vector<16x32xf32> to vector<2x8x32xf32>
    %141 = vector.shape_cast %138 : vector<16x16xf32> to vector<2x8x16xf32>
    %142 = vector.shape_cast %139 : vector<16x16xf32> to vector<2x8x16xf32>
    %143 = vector.extract_strided_slice %140 {offsets = [0, 0, 0], sizes = [2, 8, 8], strides = [1, 1, 1]} : vector<2x8x32xf32> to vector<2x8x8xf32>
    %144 = vector.extract_strided_slice %140 {offsets = [0, 0, 8], sizes = [2, 8, 8], strides = [1, 1, 1]} : vector<2x8x32xf32> to vector<2x8x8xf32>
    %145 = tpu.concatenate %143, %144 in 1 : vector<2x8x8xf32>, vector<2x8x8xf32> -> vector<2x16x8xf32>
    %146 = vector.extract_strided_slice %141 {offsets = [0, 0, 0], sizes = [2, 8, 8], strides = [1, 1, 1]} : vector<2x8x16xf32> to vector<2x8x8xf32>
    %147 = vector.extract_strided_slice %142 {offsets = [0, 0, 0], sizes = [2, 8, 8], strides = [1, 1, 1]} : vector<2x8x16xf32> to vector<2x8x8xf32>
    "tpu.trace_start"() <{level = 10 : i32, message = "bqd,bkd->bqk"}> : () -> ()
    %cst_34 = arith.constant dense<0.000000e+00> : vector<2x16x8xf32>
    %148 = tpu.matmul %145, %146, %cst_34 {dimension_numbers = #tpu.dot_dimension_numbers<[2], [2], [1], [1], [0, 0, 0, 1, 1, 1], [0], [0]>} : vector<2x16x8xf32>, vector<2x8x8xf32>, vector<2x16x8xf32> -> vector<2x16x8xf32>
    "tpu.trace_stop"() : () -> ()
    %cst_35 = arith.constant 0.353553385 : f32
    %149 = vector.broadcast %cst_35 : f32 to vector<2x16x8xf32>
    %150 = arith.mulf %148, %149 : vector<2x16x8xf32>
    %cst_36 = arith.constant dense<0xFF800000> : vector<2x16xf32>
    %151 = vector.multi_reduction <maximumf>, %150, %cst_36 [2] : vector<2x16x8xf32> to vector<2x16xf32>
    %152 = vector.shape_cast %151 : vector<2x16xf32> to vector<2x16x1xf32>
    %153 = vector.broadcast %152 : vector<2x16x1xf32> to vector<2x16x8xf32>
    %154 = arith.subf %150, %153 : vector<2x16x8xf32>
    %155 = math.exp %154 : vector<2x16x8xf32>
    %cst_37 = arith.constant dense<0.000000e+00> : vector<2x16xf32>
    %156 = vector.multi_reduction <add>, %155, %cst_37 [2] : vector<2x16x8xf32> to vector<2x16xf32>
    %157 = vector.shape_cast %156 : vector<2x16xf32> to vector<2x16x1xf32>
    %158 = vector.broadcast %157 : vector<2x16x1xf32> to vector<2x16x8xf32>
    %159 = arith.divf %155, %158 : vector<2x16x8xf32>
    "tpu.trace_start"() <{level = 10 : i32, message = "bqk,bkd->bqd"}> : () -> ()
    %cst_38 = arith.constant dense<0.000000e+00> : vector<2x16x8xf32>
    %160 = tpu.matmul %159, %147, %cst_38 {dimension_numbers = #tpu.dot_dimension_numbers<[2], [1], [1], [2], [0, 0, 0, 1, 1, 2], [0], [0]>} : vector<2x16x8xf32>, vector<2x8x8xf32>, vector<2x16x8xf32> -> vector<2x16x8xf32>
    "tpu.trace_stop"() : () -> ()
    %161 = vector.extract_strided_slice %160 {offsets = [0, 0, 0], sizes = [2, 8, 8], strides = [1, 1, 1]} : vector<2x16x8xf32> to vector<2x8x8xf32>
    %162 = vector.shape_cast %161 : vector<2x8x8xf32> to vector<16x8xf32>
    %163 = vector.extract_strided_slice %159 {offsets = [0, 0, 0], sizes = [2, 8, 8], strides = [1, 1, 1]} : vector<2x16x8xf32> to vector<2x8x8xf32>
    %164 = vector.shape_cast %163 : vector<2x8x8xf32> to vector<16x8xf32>
    %165 = vector.extract_strided_slice %160 {offsets = [0, 8, 0], sizes = [2, 8, 8], strides = [1, 1, 1]} : vector<2x16x8xf32> to vector<2x8x8xf32>
    %166 = vector.shape_cast %165 : vector<2x8x8xf32> to vector<16x8xf32>
    %167 = vector.extract_strided_slice %159 {offsets = [0, 8, 0], sizes = [2, 8, 8], strides = [1, 1, 1]} : vector<2x16x8xf32> to vector<2x8x8xf32>
    %168 = vector.shape_cast %167 : vector<2x8x8xf32> to vector<16x8xf32>
    %169 = vector.extract_strided_slice %140 {offsets = [0, 0, 16], sizes = [2, 8, 8], strides = [1, 1, 1]} : vector<2x8x32xf32> to vector<2x8x8xf32>
    %170 = vector.extract_strided_slice %140 {offsets = [0, 0, 24], sizes = [2, 8, 8], strides = [1, 1, 1]} : vector<2x8x32xf32> to vector<2x8x8xf32>
    %171 = tpu.concatenate %169, %170 in 1 : vector<2x8x8xf32>, vector<2x8x8xf32> -> vector<2x16x8xf32>
    %172 = vector.extract_strided_slice %141 {offsets = [0, 0, 8], sizes = [2, 8, 8], strides = [1, 1, 1]} : vector<2x8x16xf32> to vector<2x8x8xf32>
    %173 = vector.extract_strided_slice %142 {offsets = [0, 0, 8], sizes = [2, 8, 8], strides = [1, 1, 1]} : vector<2x8x16xf32> to vector<2x8x8xf32>
    "tpu.trace_start"() <{level = 10 : i32, message = "bqd,bkd->bqk"}> : () -> ()
    %cst_39 = arith.constant dense<0.000000e+00> : vector<2x16x8xf32>
    %174 = tpu.matmul %171, %172, %cst_39 {dimension_numbers = #tpu.dot_dimension_numbers<[2], [2], [1], [1], [0, 0, 0, 1, 1, 1], [0], [0]>} : vector<2x16x8xf32>, vector<2x8x8xf32>, vector<2x16x8xf32> -> vector<2x16x8xf32>
    "tpu.trace_stop"() : () -> ()
    %cst_40 = arith.constant 0.353553385 : f32
    %175 = vector.broadcast %cst_40 : f32 to vector<2x16x8xf32>
    %176 = arith.mulf %174, %175 : vector<2x16x8xf32>
    %cst_41 = arith.constant dense<0xFF800000> : vector<2x16xf32>
    %177 = vector.multi_reduction <maximumf>, %176, %cst_41 [2] : vector<2x16x8xf32> to vector<2x16xf32>
    %178 = vector.shape_cast %177 : vector<2x16xf32> to vector<2x16x1xf32>
    %179 = vector.broadcast %178 : vector<2x16x1xf32> to vector<2x16x8xf32>
    %180 = arith.subf %176, %179 : vector<2x16x8xf32>
    %181 = math.exp %180 : vector<2x16x8xf32>
    %cst_42 = arith.constant dense<0.000000e+00> : vector<2x16xf32>
    %182 = vector.multi_reduction <add>, %181, %cst_42 [2] : vector<2x16x8xf32> to vector<2x16xf32>
    %183 = vector.shape_cast %182 : vector<2x16xf32> to vector<2x16x1xf32>
    %184 = vector.broadcast %183 : vector<2x16x1xf32> to vector<2x16x8xf32>
    %185 = arith.divf %181, %184 : vector<2x16x8xf32>
    "tpu.trace_start"() <{level = 10 : i32, message = "bqk,bkd->bqd"}> : () -> ()
    %cst_43 = arith.constant dense<0.000000e+00> : vector<2x16x8xf32>
    %186 = tpu.matmul %185, %173, %cst_43 {dimension_numbers = #tpu.dot_dimension_numbers<[2], [1], [1], [2], [0, 0, 0, 1, 1, 2], [0], [0]>} : vector<2x16x8xf32>, vector<2x8x8xf32>, vector<2x16x8xf32> -> vector<2x16x8xf32>
    "tpu.trace_stop"() : () -> ()
    %187 = vector.extract_strided_slice %186 {offsets = [0, 0, 0], sizes = [2, 8, 8], strides = [1, 1, 1]} : vector<2x16x8xf32> to vector<2x8x8xf32>
    %188 = vector.shape_cast %187 : vector<2x8x8xf32> to vector<16x8xf32>
    %189 = vector.extract_strided_slice %185 {offsets = [0, 0, 0], sizes = [2, 8, 8], strides = [1, 1, 1]} : vector<2x16x8xf32> to vector<2x8x8xf32>
    %190 = vector.shape_cast %189 : vector<2x8x8xf32> to vector<16x8xf32>
    %191 = vector.extract_strided_slice %186 {offsets = [0, 8, 0], sizes = [2, 8, 8], strides = [1, 1, 1]} : vector<2x16x8xf32> to vector<2x8x8xf32>
    %192 = vector.shape_cast %191 : vector<2x8x8xf32> to vector<16x8xf32>
    %193 = vector.extract_strided_slice %185 {offsets = [0, 8, 0], sizes = [2, 8, 8], strides = [1, 1, 1]} : vector<2x16x8xf32> to vector<2x8x8xf32>
    %194 = vector.shape_cast %193 : vector<2x8x8xf32> to vector<16x8xf32>
    %195 = tpu.concatenate %162, %166, %188, %192 in 1 : vector<16x8xf32>, vector<16x8xf32>, vector<16x8xf32>, vector<16x8xf32> -> vector<16x32xf32>
    %196 = tpu.concatenate %164, %168, %190, %194 in 1 : vector<16x8xf32>, vector<16x8xf32>, vector<16x8xf32>, vector<16x8xf32> -> vector<16x32xf32>
    %c0_44 = arith.constant 0 : index
    %c0_45 = arith.constant 0 : index
    %197 = vector.load %arg8[%c0_44, %c0_45] : memref<16x32xf32, #tpu.memory_space<vmem>>, vector<16x32xf32>
    tpu.vector_store %arg8[%c0_44, %c0_45], %196 {strides = array<i32>} : memref<16x32xf32, #tpu.memory_space<vmem>>, vector<16x32xf32>,
    %cst_46 = arith.constant dense<0.000000e+00> : vector<16x32xf32>
    %198 = tpu.matmul %195, %7, %cst_46 {dimension_numbers = #tpu.dot_dimension_numbers<[1], [0], [0], [1], [0, 0, 1, 1], [], []>} : vector<16x32xf32>, vector<32x32xf32>, vector<16x32xf32> -> vector<16x32xf32>
    %199 = arith.addf %109, %198 : vector<16x32xf32>
    %200 = vector.broadcast %18 : vector<1x32xf32> to vector<16x32xf32>
    %201 = arith.addf %199, %200 : vector<16x32xf32>
    %cst_47 = arith.constant dense<0.000000e+00> : vector<16xf32>
    %202 = vector.multi_reduction <add>, %201, %cst_47 [1] : vector<16x32xf32> to vector<16xf32>
    %203 = vector.shape_cast %202 : vector<16xf32> to vector<16x1xf32>
    %cst_48 = arith.constant 3.200000e+01 : f32
    %204 = vector.broadcast %cst_48 : f32 to vector<16x1xf32>
    %205 = arith.divf %203, %204 : vector<16x1xf32>
    %206 = vector.broadcast %205 : vector<16x1xf32> to vector<16x32xf32>
    %207 = arith.subf %201, %206 : vector<16x32xf32>
    %208 = arith.mulf %207, %207 : vector<16x32xf32>
    %cst_49 = arith.constant dense<0.000000e+00> : vector<16xf32>
    %209 = vector.multi_reduction <add>, %208, %cst_49 [1] : vector<16x32xf32> to vector<16xf32>
    %210 = vector.shape_cast %209 : vector<16xf32> to vector<16x1xf32>
    %cst_50 = arith.constant 3.200000e+01 : f32
    %211 = vector.broadcast %cst_50 : f32 to vector<16x1xf32>
    %212 = arith.divf %210, %211 : vector<16x1xf32>
    %213 = vector.broadcast %205 : vector<16x1xf32> to vector<16x32xf32>
    %214 = arith.subf %201, %213 : vector<16x32xf32>
    %cst_51 = arith.constant 9.99999974E-6 : f32
    %215 = vector.broadcast %cst_51 : f32 to vector<16x1xf32>
    %216 = arith.addf %212, %215 : vector<16x1xf32>
    %217 = math.rsqrt %216 : vector<16x1xf32>
    %218 = vector.broadcast %217 : vector<16x1xf32> to vector<16x32xf32>
    %219 = arith.mulf %214, %218 : vector<16x32xf32>
    %220 = vector.broadcast %12 : vector<1x32xf32> to vector<16x32xf32>
    %221 = arith.mulf %219, %220 : vector<16x32xf32>
    %222 = vector.broadcast %13 : vector<1x32xf32> to vector<16x32xf32>
    %223 = arith.addf %221, %222 : vector<16x32xf32>
    %cst_52 = arith.constant dense<0.000000e+00> : vector<16x128xf32>
    %224 = tpu.matmul %223, %5, %cst_52 {dimension_numbers = #tpu.dot_dimension_numbers<[1], [0], [0], [1], [0, 0, 1, 1], [], []>} : vector<16x32xf32>, vector<32x128xf32>, vector<16x128xf32> -> vector<16x128xf32>
    %225 = vector.extract_strided_slice %224 {offsets = [0, 0], sizes = [16, 64], strides = [1, 1]} : vector<16x128xf32> to vector<16x64xf32>
    %226 = vector.extract_strided_slice %224 {offsets = [0, 64], sizes = [16, 64], strides = [1, 1]} : vector<16x128xf32> to vector<16x64xf32>
    %227 = arith.negf %225 : vector<16x64xf32>
    %228 = math.exp %227 : vector<16x64xf32>
    %cst_53 = arith.constant 1.000000e+00 : f32
    %229 = vector.broadcast %cst_53 : f32 to vector<16x64xf32>
    %230 = arith.addf %229, %228 : vector<16x64xf32>
    %231 = arith.divf %229, %230 : vector<16x64xf32>
    %232 = arith.mulf %225, %231 : vector<16x64xf32>
    %233 = arith.mulf %232, %226 : vector<16x64xf32>
    %c0_54 = arith.constant 0 : index
    %c0_55 = arith.constant 0 : index
    %234 = vector.load %arg6[%c0_54, %c0_55] : memref<64x32xf32, #tpu.memory_space<vmem>>, vector<64x32xf32>
    %cst_56 = arith.constant dense<0.000000e+00> : vector<16x32xf32>
    %235 = tpu.matmul %233, %234, %cst_56 {dimension_numbers = #tpu.dot_dimension_numbers<[1], [0], [0], [1], [0, 0, 1, 1], [], []>} : vector<16x64xf32>, vector<64x32xf32>, vector<16x32xf32> -> vector<16x32xf32>
    %236 = arith.addf %201, %235 : vector<16x32xf32>
    %c0_57 = arith.constant 0 : index
    %c0_58 = arith.constant 0 : index
    %237 = vector.load %arg7[%c0_57, %c0_58] : memref<16x32xf32, #tpu.memory_space<vmem>>, vector<16x32xf32>
    tpu.vector_store %arg7[%c0_57, %c0_58], %236 {strides = array<i32>} : memref<16x32xf32, #tpu.memory_space<vmem>>, vector<16x32xf32>,
    return
  }
  func.func @transform_0(%arg0: i32) -> (i32, i32) {
    %c0_i32 = arith.constant 0 : i32
    %c0_i32_0 = arith.constant 0 : i32
    %c0_i32_1 = arith.constant 0 : i32
    return %c0_i32, %c0_i32_0 : i32, i32
  }
  func.func @transform_1(%arg0: i32) -> (i32, i32) {
    %c0_i32 = arith.constant 0 : i32
    %c0_i32_0 = arith.constant 0 : i32
    %c0_i32_1 = arith.constant 0 : i32
    return %c0_i32, %c0_i32_0 : i32, i32
  }
  func.func @transform_2(%arg0: i32) -> (i32, i32, i32, i32) {
    %c0_i32 = arith.constant 0 : i32
    %c0_i32_0 = arith.constant 0 : i32
    %c0_i32_1 = arith.constant 0 : i32
    %c0_i32_2 = arith.constant 0 : i32
    %c0_i32_3 = arith.constant 0 : i32
    return %c0_i32, %c0_i32_0, %c0_i32_1, %c0_i32_2 : i32, i32, i32, i32
  }
  func.func @transform_3(%arg0: i32) -> (i32, i32) {
    %c0_i32 = arith.constant 0 : i32
    %c0_i32_0 = arith.constant 0 : i32
    %c0_i32_1 = arith.constant 0 : i32
    return %c0_i32, %c0_i32_0 : i32, i32
  }
  func.func @transform_4(%arg0: i32) -> (i32, i32) {
    %c0_i32 = arith.constant 0 : i32
    %c0_i32_0 = arith.constant 0 : i32
    %c0_i32_1 = arith.constant 0 : i32
    return %c0_i32, %c0_i32_0 : i32, i32
  }
  func.func @transform_5(%arg0: i32) -> (i32, i32) {
    %c0_i32 = arith.constant 0 : i32
    %c0_i32_0 = arith.constant 0 : i32
    %c0_i32_1 = arith.constant 0 : i32
    return %c0_i32, %c0_i32_0 : i32, i32
  }
  func.func @transform_6(%arg0: i32) -> (i32, i32) {
    %c0_i32 = arith.constant 0 : i32
    %c0_i32_0 = arith.constant 0 : i32
    %c0_i32_1 = arith.constant 0 : i32
    return %c0_i32, %c0_i32_0 : i32, i32
  }
  func.func @transform_7(%arg0: i32) -> (i32, i32) {
    %c0_i32 = arith.constant 0 : i32
    %c0_i32_0 = arith.constant 0 : i32
    %c0_i32_1 = arith.constant 0 : i32
    return %c0_i32, %c0_i32_0 : i32, i32
  }
}

</mosaic_0001>

<bundles_post_ra>
// kernel: transformer_decoder_layer.1
= control target key start
LH: loop header
LB: loop body
LE: loop exit
PB: predicated region body
PF: predicated region fallthrough
CT: control target
= control target key end

     0   :  { %vm44_vm0 = vcmask 261120   ;;  %s3586_s0 = inlined_call_operand.vmem [shape: f32[16,32], index: 0, kind: input, shape index: {}]   ;;  %s3587_s1 = inlined_call_operand.vmem [shape: f32[16,32], index: 1, kind: input, shape index: {}]   ;;  %s3588_s2 = inlined_call_operand.vmem [shape: f32[2,2,16,8], index: 2, kind: input, shape index: {}]   ;;  %s3589_s3 = inlined_call_operand.vmem [shape: f32[11,64], index: 3, kind: input, shape index: {}]   ;;  %s3590_s4 = inlined_call_operand.vmem [shape: f32[32,320], index: 4, kind: input, shape index: {}]   ;;  %s3591_s5 = inlined_call_operand.vmem [shape: f32[64,32], index: 5, kind: input, shape index: {}]   ;;  %s3592_s6 = inlined_call_operand.hbm [shape: f32[16,32], index: 6, kind: output, shape index: {0}]   ;;  %s3593_s7 = inlined_call_operand.vmem [shape: f32[16,32], index: 7, kind: output, shape index: {1}]  }
   0x1   :  { %v3104_v0 = vld [vmem:[%s3586_s0] sm:$0xff]  ;;  %v3109_v1 = vld [vmem:[%s3586_s0 + $0x8] sm:$0xff] }
   0x2   :  { %13 = vsyncpa [#allocation3], 0  ;;  %v45_v2 = vsel %vm44_vm0, %v3104_v0, 0.0  ;;  %v48_v3 = vsel %vm44_vm0, %v3109_v1, 0.0  ;;  %v3122_v14 = vld [vmem:[%s3590_s4] sm:$0xff]  ;;  %v3127_v15 = vld [vmem:[%s3590_s4 + $0x18] sm:$0xff]  ;;  %v72_v22 = vlaneseq }
   0x3   :  { %46 = vadd.xlane.f32.xlu0 %v45_v2  ;;  %v3132_v16 = vld [vmem:[%s3590_s4 + $0x30] sm:$0xff]  ;;  %v2830_v17 = vpack.c.bf16 %v3127_v15, %v3122_v14  ;;  %v3139_v18 = vld [vmem:[%s3590_s4 + $0x48] sm:$0xff]  ;;  %v3149_v29 = vld [vmem:[%s3589_s3] sm:$0xff]  ;;  %vm185_vm1 = vcmask 64512   ;;  %s3047_s14 = smov 96   ;;  %s3048_s15 = smov 120  }
   0x4   :  { %v2834_v19 = vpack.c.bf16 %v3139_v18, %v3132_v16  ;;  %v3143_v26 = vshrl.u32 %v72_v22, 7  ;;  %v170_v52 = vld [vmem:[%s3588_s2 + $0x8] sm:$0xff]  ;;  %v169_v55 = vld [vmem:[%s3588_s2] sm:$0xff]  ;;  %s3049_s24 = smov 80   ;;  %s3050_s25 = smov 88   ;;  %vm990_vm2 = vcmask 130048  }
   0x5   :  { %2831 = vmatprep.subr.bf16.mxu1 %v2830_v17  ;;  %v173_v62 = vld [vmem:[%s3588_s2 + $0x20] sm:$0xff]  ;;  %s3051_s26 = smov 112   ;;  %s3053_s11 = smov 64   ;;  %vm993_vm3 = vcmask 195584   ;;  %vm2409_vm4 = vcmask 523264  }
   0x6   :  { %2833 = vmatpush3.bf16.msra.mxu1 %v2830_v17  ;;  %v74_v28 = vsub.s32 0, %v3143_v26  ;;  %v80_v30 = vsub.s32 1, %v3143_v26  ;;  %v86_v41 = vsub.s32 6, %v3143_v26  ;;  %s3054_s12 = smov 8   ;;  %s3055_s13 = smov 16  }
   0x7   :  { %49 = vadd.xlane.f32.xlu0 %v48_v3  ;;  %2835 = vmatprep.subr.bf16.mxu1 %v2834_v19  ;;  %s3056_s16 = smov 24   ;;  %s3057_s17 = smov 32  }
   0x8   :  { %v75_v31 = vrot.slane %v3149_v29, %v74_v28  ;;  %v81_v34 = vrot.slane %v3149_v29, %v80_v30  ;;  %v87_v42 = vrot.slane %v3149_v29, %v86_v41  ;;  %s3059_s8 = smov [#allocation2]  }
   0x9   :  { %s2500_s9 = sshll.u32 %s3059_s8, 4  ;;  %s2501_s9 = int_to_ptr.vmem [resolvable:$true] %s2500_s9 }
   0xa   :  { %2837 = vmatpush3.bf16.msra.mxu1 %v2834_v19  ;;  %s3023_s10 = scalar_lea.vmem %s2501_s9, 256  ;;  %p3028_p1 = scmp.lt.s32.totalorder %s2501_s9, %s2501_s9 }
   0xb   :  { %p3024_p0 = scmp.ne.s32.totalorder %s2501_s9, %s3023_s10  ;;  %p3029_p2 = scmp.lt.s32.totalorder %s3023_s10, %s3023_s10 }
   0xd   :  { %p3030_p3 = por %p3029_p2, %p3028_p1 }
   0xf   :  { %p3031_p4 = pnand %p3030_p3, %p3024_p0 }
  0x90   :  { %v47_v4 = vpop.xlane.xlu0 %46 }
  0x91   :  { %v52_v5 = vmul.f32 0.03125, %v47_v4  ;;  %v174_v4 = vld [vmem:[%s3588_s2 + $0x28] sm:$0xff] }
  0x93   :  { %v54_v6 = vsub.f32 %v3104_v0, %v52_v5 }
  0x94   :  { %v50_v7 = vpop.xlane.xlu0 %49 }
  0x95   :  { %v53_v8 = vmul.f32 0.03125, %v50_v7  ;;  %v56_v9 = vmul.f32 %v54_v6, %v54_v6 }
  0x97   :  { %v55_v10 = vsub.f32 %v3109_v1, %v53_v8  ;;  %v58_v11 = vsel %vm44_vm0, %v56_v9, 0.0 }
  0x98   :  { %59 = vadd.xlane.f32.xlu1 %v58_v11 }
  0x99   :  { %v57_v12 = vmul.f32 %v55_v10, %v55_v10 }
  0x9b   :  { %v61_v13 = vsel %vm44_vm0, %v57_v12, 0.0 }
  0x9c   :  { %62 = vadd.xlane.f32.xlu1 %v61_v13 }
 0x125   :  { %v60_v20 = vpop.xlane.xlu1 %59 }
 0x126   :  { %v64_v21 = vmul.f32 0.03125, %v60_v20 }
 0x128   :  { %v66_v23 = vadd.f32 1e-05, %v64_v21 }
 0x129   :  { %v63_v24 = vpop.xlane.xlu1 %62 }
 0x12a   :  { %2938 = vrsqrt.f32 %v66_v23  ;;  %v65_v25 = vmul.f32 0.03125, %v63_v24 }
 0x12c   :  { %v67_v27 = vadd.f32 1e-05, %v65_v25 }
 0x12e   :  { %2940 = vrsqrt.f32 %v67_v27 }
 0x134   :  { %v2939_v32 = vpop.eup %2938 }
 0x135   :  { %v70_v33 = vmul.f32 %v2939_v32, %v54_v6 }
 0x137   :  { %v76_v35 = vmul.f32 %v75_v31, %v70_v33 }
 0x138   :  { %v2941_v36 = vpop.eup %2940 }
 0x139   :  { %v71_v37 = vmul.f32 %v2941_v36, %v55_v10  ;;  %v82_v38 = vadd.f32 %v81_v34, %v76_v35 }
 0x13b   :  { %v77_v39 = vmul.f32 %v75_v31, %v71_v37  ;;  %2673 = vmatprep.mubr.msk.f32.mxu1 %vm44_vm0, %v82_v38 }
 0x13d   :  { %v83_v40 = vadd.f32 %v81_v34, %v77_v39 }
 0x13f   :  { %2674 = vmatmul.mubr.msk.f32.vlgmr.msra.gmra.mrb[0].mxu1 %vm44_vm0, %v83_v40 }
 0x212   :  { %v2675_v43 = vpop.f32.mrb[0].mxu1 }
 0x213   :  { %v3162_v44 = vadd.f32 %v2675_v43, %v87_v42  ;;  %v160_v45 = vpop.f32.mrb[1].mxu1 }
 0x214   :  { %v3164_v46 = vadd.f32 %v160_v45, %v87_v42 }
 0x215   :  { %267 = vrot.lane.b32.xlu1 %v3162_v44, %s3047_s14 }
 0x216   :  { %183 = vrot.lane.b32.xlu0 %v3164_v46, %s3047_s14  ;;  %2678 = vmatprep.mubr.msk.f32.mxu1 %vm185_vm1, %v3164_v46 }
 0x219   :  { %179 = vrot.lane.b32.xlu1 %v3164_v46, %s3048_s15 }
 0x21d   :  { %181 = vrot.lane.b32.xlu1 %v3162_v44, %s3048_s15 }
 0x287   :  { %v268_v47 = vpop.permute.xlu1 %267 }
 0x288   :  { %v184_v48 = vpop.permute.xlu0 %183 }
 0x289   :  { %2676 = vmatprep.subr.msk.mxu1 %vm185_vm1, %v184_v48 }
 0x28a   :  { %2677 = vmatpush3.xpose.msk.msra.mxu1 %vm185_vm1, %v184_v48 }
 0x28b   :  { %v180_v49 = vpop.permute.xlu1 %179  ;;  %2681 = vmatprep.subr.msk.mxu1 %vm185_vm1, %v268_v47 }
 0x28d   :  { %2679 = vmatmul.mubr.msk.f32.vlgmr.msra.gmra.mrb[2].mxu1 %vm185_vm1, %v180_v49 }
 0x28e   :  { %2682 = vmatpush3.xpose.msk.msra.mxu1 %vm185_vm1, %v268_v47  ;;  %2683 = vmatprep.mubr.msk.f32.mxu1 %vm185_vm1, %v3162_v44 }
 0x28f   :  { %v3183_v50 = vpop.permute.xlu1 %181 }
 0x291   :  { %2684 = vmatmul.mubr.msk.f32.vlgmr.msra.gmra.mrb[4].mxu1 %vm185_vm1, %v3183_v50 }
 0x360   :  { %v2680_v51 = vpop.f32.mrb[2].mxu1 }
 0x361   :  { %v351_v53 = vmul.f32 0.35355338, %v2680_v51  ;;  %v258_v54 = vpop.f32.mrb[3].mxu1 }
 0x362   :  { %v350_v56 = vmul.f32 0.35355338, %v258_v54 }
 0x363   :  { %v355_v57 = vadd.f32 %v351_v53, %v170_v52 }
 0x364   :  { %v2685_v58 = vpop.f32.mrb[4].mxu1  ;;  %v354_v59 = vadd.f32 %v350_v56, %v169_v55 }
 0x365   :  { %v341_v60 = vpop.f32.mrb[5].mxu1  ;;  %v361_v61 = vsel %vm185_vm1, %v355_v57, -inf  ;;  %v353_v63 = vmul.f32 0.35355338, %v2685_v58 }
 0x366   :  { %v352_v2 = vmul.f32 0.35355338, %v341_v60  ;;  %362 = vmax.xlane.f32.xlu1 %v361_v61  ;;  %v358_v3 = vsel %vm185_vm1, %v354_v59, -inf }
 0x367   :  { %359 = vmax.xlane.f32.xlu0 %v358_v3  ;;  %v357_v7 = vadd.f32 %v353_v63, %v174_v4  ;;  %v171_v3 = vld [vmem:[%s3588_s2 + $0x10] sm:$0xff] }
 0x368   :  { %v356_v5 = vadd.f32 %v352_v2, %v173_v62  ;;  %v172_v62 = vld [vmem:[%s3588_s2 + $0x18] sm:$0xff] }
 0x369   :  { %v367_v8 = vsel %vm185_vm1, %v357_v7, -inf }
 0x36a   :  { %v364_v6 = vsel %vm185_vm1, %v356_v5, -inf }
 0x36b   :  { %365 = vmax.xlane.f32.xlu0 %v364_v6 }
 0x36f   :  { %368 = vmax.xlane.f32.xlu0 %v367_v8 }
 0x377   :  { %486 = vrot.lane.b32.xlu1 %v3162_v44, %s3049_s24 }
 0x37b   :  { %574 = vrot.lane.b32.xlu1 %v3164_v46, %s3050_s25 }
 0x37f   :  { %661 = vrot.lane.b32.xlu1 %v3162_v44, %s3050_s25 }
 0x383   :  { %572 = vrot.lane.b32.xlu1 %v180_v49, %s3051_s26 }
 0x385   :  { %402 = vrot.lane.b32.xlu0 %v3164_v46, %s3049_s24 }
 0x389   :  { %570 = vrot.lane.b32.xlu0 %v3164_v46, %s3051_s26 }
 0x3f3   :  { %v363_v9 = vpop.xlane.xlu1 %362 }
 0x3f4   :  { %v371_v10 = vsub.f32 %v355_v57, %v363_v9  ;;  %v360_v11 = vpop.xlane.xlu0 %359 }
 0x3f5   :  { %v370_v12 = vsub.f32 %v354_v59, %v360_v11 }
 0x3f6   :  { %v376_v13 = vmul.f32 1.442695, %v371_v10 }
 0x3f7   :  { %v374_v17 = vmul.f32 1.442695, %v370_v12  ;;  %v487_v19 = vpop.permute.xlu1 %486 }
 0x3f8   :  { %2942 = vpow2.f32 %v376_v13  ;;  %2691 = vmatprep.subr.mxu1 %v487_v19  ;;  %v366_v20 = vpop.xlane.xlu0 %365  ;;  %v175_v13 = vld [vmem:[%s3588_s2 + $0x30] sm:$0xff] }
 0x3f9   :  { %2944 = vpow2.f32 %v374_v17  ;;  %v372_v21 = vsub.f32 %v356_v5, %v366_v20  ;;  %2692 = vmatpush3.msra.mxu1 %v487_v19  ;;  %v176_v20 = vld [vmem:[%s3588_s2 + $0x38] sm:$0xff]  ;;  %s3052_s2 = smov 72  }
 0x3fb   :  { %v378_v22 = vmul.f32 1.442695, %v372_v21  ;;  %v575_v23 = vpop.permute.xlu1 %574 }
 0x3fc   :  { %v369_v24 = vpop.xlane.xlu0 %368 }
 0x3fd   :  { %2946 = vpow2.f32 %v378_v22  ;;  %v373_v25 = vsub.f32 %v357_v7, %v369_v24 }
 0x3ff   :  { %v380_v27 = vmul.f32 1.442695, %v373_v25  ;;  %v662_v31 = vpop.permute.xlu1 %661 }
 0x400   :  { %2701 = vmatprep.subr.msk.mxu1 %vm185_vm1, %v662_v31  ;;  %v403_v32 = vpop.permute.xlu0 %402 }
 0x401   :  { %2948 = vpow2.f32 %v380_v27  ;;  %2686 = vmatprep.subr.mxu0 %v403_v32 }
 0x402   :  { %v2943_v33 = vpop.eup %2942  ;;  %2687 = vmatpush3.msra.mxu0 %v403_v32 }
 0x403   :  { %v2945_v34 = vpop.eup %2944  ;;  %2696 = vmatprep.subr.msk.mxu0 %vm185_vm1, %v575_v23  ;;  %v385_v35 = vsel %vm185_vm1, %v2943_v33, 0.0  ;;  %v573_v41 = vpop.permute.xlu1 %572 }
 0x404   :  { %386 = vadd.xlane.f32.xlu1 %v385_v35  ;;  %v382_v36 = vsel %vm185_vm1, %v2945_v34, 0.0  ;;  %v571_v42 = vpop.permute.xlu0 %570 }
 0x405   :  { %383 = vadd.xlane.f32.xlu0 %v382_v36 }
 0x407   :  { %v2947_v37 = vpop.eup %2946 }
 0x408   :  { %v388_v38 = vsel %vm185_vm1, %v2947_v37, 0.0 }
 0x409   :  { %389 = vadd.xlane.f32.xlu0 %v388_v38 }
 0x40b   :  { %v2949_v39 = vpop.eup %2948 }
 0x40c   :  { %v391_v40 = vsel %vm185_vm1, %v2949_v39, 0.0 }
 0x40d   :  { %392 = vadd.xlane.f32.xlu1 %v391_v40 }
 0x41e   :  { %659 = vrot.lane.b32.xlu1 %v3183_v50, %s3051_s26 }
 0x41f   :  { %657 = vrot.lane.b32.xlu0 %v3162_v44, %s3051_s26 }
 0x491   :  { %v387_v43 = vpop.xlane.xlu1 %386 }
 0x492   :  { %2950 = vrcp.f32 %v387_v43  ;;  %v384_v45 = vpop.xlane.xlu0 %383 }
 0x493   :  { %2952 = vrcp.f32 %v384_v45 }
 0x496   :  { %v390_v47 = vpop.xlane.xlu0 %389 }
 0x497   :  { %2954 = vrcp.f32 %v390_v47 }
 0x49a   :  { %v393_v48 = vpop.xlane.xlu1 %392  ;;  %v658_v57 = vpop.permute.xlu0 %657 }
 0x49b   :  { %2956 = vrcp.f32 %v393_v48 }
 0x49c   :  { %v2951_v49 = vpop.eup %2950 }
 0x49d   :  { %v2953_v51 = vpop.eup %2952  ;;  %v399_v53 = vmul.f32 %v2951_v49, %v2943_v33 }
 0x49e   :  { %v398_v52 = vmul.f32 %v2953_v51, %v2945_v34  ;;  %v660_v58 = vpop.permute.xlu1 %659 }
 0x4a0   :  { %2688 = vmatprep.mubr.msk.f32.mxu0 %vm185_vm1, %v398_v52  ;;  %v3259_v52 = vpack.i.bf16 %v3127_v15, %v3122_v14 }
 0x4a1   :  { %v2955_v50 = vpop.eup %2954  ;;  %2689 = vmatmul.mubr.msk.f32.vlgmr.msra.gmra.mrb[0].mxu0 %vm185_vm1, %v399_v53  ;;  %v3266_v53 = vpack.i.bf16 %v3139_v18, %v3132_v16 }
 0x4a2   :  { %2697 = vmatpush3.xpose.msk.msra.mxu0 %vm185_vm1, %v575_v23  ;;  %2698 = vmatprep.mubr.msk.f32.mxu0 %vm185_vm1, %v571_v42  ;;  %v400_v54 = vmul.f32 %v2955_v50, %v2947_v37 }
 0x4a4   :  { %2693 = vmatprep.mubr.msk.f32.mxu1 %vm185_vm1, %v400_v54 }
 0x4a5   :  { %v2957_v55 = vpop.eup %2956  ;;  %2699 = vmatmul.mubr.msk.f32.vlgmr.msra.gmra.mrb[2].mxu0 %vm185_vm1, %v573_v41 }
 0x4a6   :  { %v401_v56 = vmul.f32 %v2957_v55, %v2949_v39 }
 0x4a8   :  { %2694 = vmatmul.mubr.msk.f32.vlgmr.msra.gmra.mrb[6].mxu1 %vm185_vm1, %v401_v56 }
 0x4a9   :  { %2702 = vmatpush3.xpose.msk.msra.mxu1 %vm185_vm1, %v662_v31  ;;  %2703 = vmatprep.mubr.msk.f32.mxu1 %vm185_vm1, %v658_v57 }
 0x4ac   :  { %2704 = vmatmul.mubr.msk.f32.vlgmr.msra.gmra.mrb[8].mxu1 %vm185_vm1, %v660_v58 }
 0x574   :  { %v3230_v59 = vpop.f32.mrb[0].mxu0 }
 0x575   :  { %v3232_v60 = vpop.f32.mrb[1].mxu0 }
 0x578   :  { %v2700_v61 = vpop.f32.mrb[2].mxu0 }
 0x579   :  { %v745_v63 = vmul.f32 0.35355338, %v2700_v61  ;;  %v648_v2 = vpop.f32.mrb[3].mxu0 }
 0x57a   :  { %v744_v4 = vmul.f32 0.35355338, %v648_v2 }
 0x57b   :  { %v2695_v5 = vpop.f32.mrb[6].mxu1  ;;  %v749_v6 = vadd.f32 %v745_v63, %v172_v62 }
 0x57c   :  { %v3240_v7 = vpop.f32.mrb[7].mxu1  ;;  %v748_v8 = vadd.f32 %v744_v4, %v171_v3 }
 0x57d   :  { %v755_v9 = vsel %vm185_vm1, %v749_v6, -inf }
 0x57e   :  { %756 = vmax.xlane.f32.xlu1 %v755_v9  ;;  %v752_v10 = vsel %vm185_vm1, %v748_v8, -inf }
 0x57f   :  { %753 = vmax.xlane.f32.xlu0 %v752_v10  ;;  %v2705_v11 = vpop.f32.mrb[8].mxu1 }
 0x580   :  { %v735_v12 = vpop.f32.mrb[9].mxu1  ;;  %v747_v17 = vmul.f32 0.35355338, %v2705_v11 }
 0x581   :  { %v746_v19 = vmul.f32 0.35355338, %v735_v12 }
 0x582   :  { %v751_v23 = vadd.f32 %v747_v17, %v176_v20 }
 0x583   :  { %v750_v21 = vadd.f32 %v746_v19, %v175_v13 }
 0x584   :  { %v761_v24 = vsel %vm185_vm1, %v751_v23, -inf }
 0x585   :  { %v758_v22 = vsel %vm185_vm1, %v750_v21, -inf }
 0x586   :  { %759 = vmax.xlane.f32.xlu0 %v758_v22 }
 0x58a   :  { %762 = vmax.xlane.f32.xlu0 %v761_v24 }
 0x60b   :  { %v757_v25 = vpop.xlane.xlu1 %756 }
 0x60c   :  { %v765_v27 = vsub.f32 %v749_v6, %v757_v25  ;;  %v754_v31 = vpop.xlane.xlu0 %753 }
 0x60d   :  { %v764_v32 = vsub.f32 %v748_v8, %v754_v31 }
 0x60e   :  { %v770_v33 = vmul.f32 1.442695, %v765_v27 }
 0x60f   :  { %v768_v34 = vmul.f32 1.442695, %v764_v32 }
 0x610   :  { %2958 = vpow2.f32 %v770_v33 }
 0x611   :  { %2960 = vpow2.f32 %v768_v34 }
 0x613   :  { %v760_v35 = vpop.xlane.xlu0 %759 }
 0x614   :  { %v766_v36 = vsub.f32 %v750_v21, %v760_v35 }
 0x616   :  { %v772_v37 = vmul.f32 1.442695, %v766_v36 }
 0x617   :  { %v763_v38 = vpop.xlane.xlu0 %762 }
 0x618   :  { %2962 = vpow2.f32 %v772_v37  ;;  %v767_v39 = vsub.f32 %v751_v23, %v763_v38 }
 0x61a   :  { %v2959_v40 = vpop.eup %2958  ;;  %v774_v41 = vmul.f32 1.442695, %v767_v39 }
 0x61b   :  { %v2961_v42 = vpop.eup %2960  ;;  %v779_v43 = vsel %vm185_vm1, %v2959_v40, 0.0 }
 0x61c   :  { %2964 = vpow2.f32 %v774_v41  ;;  %780 = vadd.xlane.f32.xlu1 %v779_v43  ;;  %v776_v45 = vsel %vm185_vm1, %v2961_v42, 0.0 }
 0x61d   :  { %777 = vadd.xlane.f32.xlu0 %v776_v45 }
 0x622   :  { %v2963_v47 = vpop.eup %2962 }
 0x623   :  { %v782_v48 = vsel %vm185_vm1, %v2963_v47, 0.0 }
 0x624   :  { %783 = vadd.xlane.f32.xlu0 %v782_v48 }
 0x626   :  { %v2965_v49 = vpop.eup %2964 }
 0x627   :  { %v785_v51 = vsel %vm185_vm1, %v2965_v49, 0.0 }
 0x628   :  { %786 = vadd.xlane.f32.xlu1 %v785_v51 }
 0x639   :  { %880 = vrot.lane.b32.xlu1 %v3162_v44, %s3052_s2 }
 0x63a   :  { %796 = vrot.lane.b32.xlu0 %v3164_v46, %s3052_s2 }
 0x63d   :  { %2909 = vrot.lane.b32.xlu1 %v3259_v52, %s3053_s11 }
 0x63e   :  { %966 = vrot.lane.b32.xlu0 %v3230_v59, %s3054_s12 }
 0x641   :  { %2914 = vrot.lane.b32.xlu1 %v3266_v53, %s3053_s11 }
 0x645   :  { %968 = vrot.lane.b32.xlu1 %v2695_v5, %s3054_s12 }
 0x6a9   :  { %v781_v14 = vpop.xlane.xlu1 %780 }
 0x6aa   :  { %2966 = vrcp.f32 %v781_v14  ;;  %v778_v15 = vpop.xlane.xlu0 %777  ;;  %v3317_v14 = vld [vmem:[%s3590_s4 + $0x28] sm:$0xff] }
 0x6ab   :  { %2968 = vrcp.f32 %v778_v15  ;;  %v3322_v15 = vld [vmem:[%s3590_s4 + $0x40] sm:$0xff] }
 0x6b1   :  { %v784_v44 = vpop.xlane.xlu0 %783 }
 0x6b2   :  { %2970 = vrcp.f32 %v784_v44 }
 0x6b4   :  { %v2967_v46 = vpop.eup %2966 }
 0x6b5   :  { %v2969_v50 = vpop.eup %2968  ;;  %v787_v54 = vpop.xlane.xlu1 %786  ;;  %v793_v55 = vmul.f32 %v2967_v46, %v2959_v40  ;;  %v42_v46 = vld [vmem:[%s3587_s1] sm:$0xff] }
 0x6b6   :  { %v797_v16 = vpop.permute.xlu0 %796  ;;  %2972 = vrcp.f32 %v787_v54  ;;  %v792_v18 = vmul.f32 %v2969_v50, %v2961_v42  ;;  %v43_v54 = vld [vmem:[%s3587_s1 + $0x8] sm:$0xff] }
 0x6b7   :  { %2706 = vmatprep.subr.mxu0 %v797_v16 }
 0x6b8   :  { %2707 = vmatpush3.msra.mxu0 %v797_v16  ;;  %2708 = vmatprep.mubr.msk.f32.mxu0 %vm185_vm1, %v792_v18 }
 0x6b9   :  { %v881_v56 = vpop.permute.xlu1 %880  ;;  %2709 = vmatmul.mubr.msk.f32.vlgmr.msra.gmra.mrb[4].mxu0 %vm185_vm1, %v793_v55 }
 0x6ba   :  { %2711 = vmatprep.subr.mxu1 %v881_v56  ;;  %v967_v13 = vpop.permute.xlu0 %966 }
 0x6bb   :  { %2712 = vmatpush3.msra.mxu1 %v881_v56  ;;  %v988_v19 = vsel %vm185_vm1, %v3232_v60, %v967_v13  ;;  %v1097_v60 = vsub.s32 7, %v3143_v26 }
 0x6bc   :  { %v2971_v57 = vpop.eup %2970 }
 0x6bd   :  { %v2910_v58 = vpop.permute.xlu1 %2909  ;;  %v794_v59 = vmul.f32 %v2971_v57, %v2963_v47  ;;  %v1098_v33 = vrot.slane %v3149_v29, %v1097_v60 }
 0x6be   :  { %v2912_v61 = vunpack.i.h.bf16 %v2910_v58  ;;  %v2911_v62 = vunpack.i.l.bf16 %v2910_v58 }
 0x6bf   :  { %2713 = vmatprep.mubr.msk.f32.mxu1 %vm185_vm1, %v794_v59 }
 0x6c0   :  { %v2973_v63 = vpop.eup %2972  ;;  %v2838_v2 = vpack.c.bf16 %v2912_v61, %v2911_v62 }
 0x6c1   :  { %v795_v3 = vmul.f32 %v2973_v63, %v2965_v49  ;;  %v2915_v4 = vpop.permute.xlu1 %2914 }
 0x6c2   :  { %v2917_v5 = vunpack.i.h.bf16 %v2915_v4  ;;  %v2916_v6 = vunpack.i.l.bf16 %v2915_v4  ;;  %2839 = vmatprep.subr.bf16.mxu0 %v2838_v2 }
 0x6c3   :  { %2714 = vmatmul.mubr.msk.f32.vlgmr.msra.gmra.mrb[10].mxu1 %vm185_vm1, %v795_v3  ;;  %2841 = vmatpush3.bf16.msra.mxu0 %v2838_v2 }
 0x6c4   :  { %v2842_v8 = vpack.c.bf16 %v2917_v5, %v2916_v6  ;;  %v1129_v6 = vsub.s32 2, %v3143_v26 }
 0x6c5   :  { %v969_v23 = vpop.permute.xlu1 %968 }
 0x6c6   :  { %2843 = vmatprep.subr.bf16.mxu0 %v2842_v8  ;;  %v989_v25 = vsel %vm185_vm1, %v3240_v7, %v969_v23  ;;  %v3352_v23 = vld [vmem:[%s3589_s3 + $0x8] sm:$0x7] }
 0x6c7   :  { %2845 = vmatpush3.bf16.msra.mxu0 %v2842_v8 }
 0x78c   :  { %v2710_v9 = vpop.f32.mrb[4].mxu0 }
 0x78d   :  { %v871_v10 = vpop.f32.mrb[5].mxu0 }
 0x78e   :  { %974 = vrot.lane.b32.xlu0 %v871_v10, %s3055_s13  ;;  %v1130_v10 = vrot.slane %v3149_v29, %v1129_v6 }
 0x792   :  { %982 = vrot.lane.b32.xlu0 %v2710_v9, %s3056_s16 }
 0x796   :  { %v2715_v11 = vpop.f32.mrb[10].mxu1 }
 0x797   :  { %v955_v12 = vpop.f32.mrb[11].mxu1 }
 0x798   :  { %976 = vrot.lane.b32.xlu1 %v955_v12, %s3055_s13 }
 0x79c   :  { %984 = vrot.lane.b32.xlu1 %v2715_v11, %s3056_s16  ;;  %v1135_v11 = vsub.s32 3, %v3143_v26 }
 0x800   :  { %v975_v17 = vpop.permute.xlu0 %974 }
 0x801   :  { %v991_v20 = vsel %vm990_vm2, %v988_v19, %v975_v17  ;;  %v1136_v19 = vrot.slane %v3149_v29, %v1135_v11 }
 0x804   :  { %v983_v21 = vpop.permute.xlu0 %982 }
 0x805   :  { %v994_v22 = vsel %vm993_vm3, %v991_v20, %v983_v21 }
 0x806   :  { %2724 = vmatprep.mubr.msk.f32.mxu0 %vm44_vm0, %v994_v22 }
 0x80a   :  { %v977_v24 = vpop.permute.xlu1 %976 }
 0x80b   :  { %v992_v27 = vsel %vm990_vm2, %v989_v25, %v977_v24  ;;  %v1239_v24 = vrot.slane %v3352_v23, %v80_v30 }
 0x80e   :  { %v985_v31 = vpop.permute.xlu1 %984 }
 0x80f   :  { %v995_v32 = vsel %vm993_vm3, %v992_v27, %v985_v31 }
 0x810   :  { %2725 = vmatmul.mubr.msk.f32.vlgmr.msra.gmra.mrb[6].mxu0 %vm44_vm0, %v995_v32  ;;  %v1142_v32 = vrot.slane %v3352_v23, %v74_v28 }
 0x811   :  { %2746 = vmatprep.mubr.msk.f32.mxu0 %vm44_vm0, %v42_v46 }
 0x8e3   :  { %v2726_v34 = vpop.f32.mrb[6].mxu0 }
 0x8e4   :  { %v1094_v35 = vadd.f32 %v2726_v34, %v3109_v1  ;;  %v1084_v36 = vpop.f32.mrb[7].mxu0 }
 0x8e5   :  { %v1093_v37 = vadd.f32 %v1084_v36, %v3104_v0 }
 0x8e6   :  { %v3295_v38 = vadd.f32 %v1098_v33, %v1094_v35 }
 0x8e7   :  { %v3297_v7 = vadd.f32 %v1098_v33, %v1093_v37 }
 0x8e8   :  { %v1104_v39 = vsel %vm44_vm0, %v3295_v38, 0.0 }
 0x8e9   :  { %1105 = vadd.xlane.f32.xlu1 %v1104_v39  ;;  %v1101_v40 = vsel %vm44_vm0, %v3297_v7, 0.0 }
 0x8ea   :  { %1102 = vadd.xlane.f32.xlu0 %v1101_v40 }
 0x8fa   :  { %2924 = vrot.lane.b32.xlu1 %v3266_v53, %s3057_s17  ;;  %v3312_v53 = vld [vmem:[%s3590_s4 + $0x10] sm:$0xff] }
 0x8fb   :  { %v2854_v44 = vpack.c.bf16 %v3317_v14, %v3312_v53 }
 0x8fd   :  { %2855 = vmatprep.subr.bf16.mxu0 %v2854_v44 }
 0x8fe   :  { %2857 = vmatpush3.bf16.msra.mxu0 %v2854_v44 }
 0x976   :  { %v1106_v41 = vpop.xlane.xlu1 %1105 }
 0x977   :  { %v1108_v1 = vmul.f32 0.03125, %v1106_v41  ;;  %v1103_v42 = vpop.xlane.xlu0 %1102 }
 0x978   :  { %v1107_v43 = vmul.f32 0.03125, %v1103_v42 }
 0x979   :  { %v1110_v0 = vsub.f32 %v3295_v38, %v1108_v1 }
 0x97a   :  { %v1109_v45 = vsub.f32 %v3297_v7, %v1107_v43  ;;  %v2925_v57 = vpop.permute.xlu1 %2924 }
 0x97b   :  { %v1112_v47 = vmul.f32 %v1110_v0, %v1110_v0  ;;  %v2927_v61 = vunpack.i.h.bf16 %v2925_v57  ;;  %v2926_v62 = vunpack.i.l.bf16 %v2925_v57 }
 0x97c   :  { %v1111_v49 = vmul.f32 %v1109_v45, %v1109_v45 }
 0x97d   :  { %v1116_v48 = vsel %vm44_vm0, %v1112_v47, 0.0  ;;  %v2850_v5 = vpack.c.bf16 %v2927_v61, %v2926_v62 }
 0x97e   :  { %1117 = vadd.xlane.f32.xlu0 %v1116_v48  ;;  %v1113_v51 = vsel %vm44_vm0, %v1111_v49, 0.0 }
 0x982   :  { %1114 = vadd.xlane.f32.xlu0 %v1113_v51 }
 0x998   :  { %2919 = vrot.lane.b32.xlu0 %v3259_v52, %s3057_s17  ;;  %v3329_v52 = vld [vmem:[%s3590_s4 + $0x58] sm:$0xff] }
 0x999   :  { %v2858_v50 = vpack.c.bf16 %v3329_v52, %v3322_v15 }
 0x99b   :  { %2859 = vmatprep.subr.bf16.mxu0 %v2858_v50 }
 0x99c   :  { %2861 = vmatpush3.bf16.msra.mxu0 %v2858_v50 }
 0x99f   :  { %2747 = vmatmul.mubr.msk.f32.vlgmr.msra.gmra.mrb[8].mxu0 %vm44_vm0, %v43_v54 }
 0xa0b   :  { %v1118_v16 = vpop.xlane.xlu0 %1117 }
 0xa0c   :  { %v1120_v18 = vmul.f32 0.03125, %v1118_v16 }
 0xa0e   :  { %v1122_v55 = vadd.f32 1e-05, %v1120_v18 }
 0xa0f   :  { %v1115_v56 = vpop.xlane.xlu0 %1114 }
 0xa10   :  { %2974 = vrsqrt.f32 %v1122_v55  ;;  %v1119_v58 = vmul.f32 0.03125, %v1115_v56 }
 0xa12   :  { %v1121_v59 = vadd.f32 1e-05, %v1119_v58 }
 0xa13   :  { %v2920_v63 = vpop.permute.xlu0 %2919 }
 0xa14   :  { %2976 = vrsqrt.f32 %v1121_v59  ;;  %v2922_v2 = vunpack.i.h.bf16 %v2920_v63  ;;  %v2921_v3 = vunpack.i.l.bf16 %v2920_v63 }
 0xa16   :  { %v2846_v4 = vpack.c.bf16 %v2922_v2, %v2921_v3 }
 0xa18   :  { %2847 = vmatprep.subr.bf16.mxu1 %v2846_v4 }
 0xa19   :  { %2849 = vmatpush3.bf16.msra.mxu1 %v2846_v4 }
 0xa1a   :  { %v2975_v8 = vpop.eup %2974  ;;  %2851 = vmatprep.subr.bf16.mxu1 %v2850_v5 }
 0xa1b   :  { %v1126_v9 = vmul.f32 %v2975_v8, %v1110_v0 }
 0xa1d   :  { %2853 = vmatpush3.bf16.msra.mxu1 %v2850_v5  ;;  %v1132_v17 = vmul.f32 %v1130_v10, %v1126_v9 }
 0xa1e   :  { %v2977_v12 = vpop.eup %2976 }
 0xa1f   :  { %v1125_v13 = vmul.f32 %v2977_v12, %v1109_v45  ;;  %v1138_v22 = vadd.f32 %v1136_v19, %v1132_v17 }
 0xa21   :  { %v1131_v20 = vmul.f32 %v1130_v10, %v1125_v13 }
 0xa23   :  { %v1137_v21 = vadd.f32 %v1136_v19, %v1131_v20 }
 0xa25   :  { %2735 = vmatprep.mubr.msk.f32.mxu1 %vm44_vm0, %v1137_v21 }
 0xa26   :  { %2736 = vmatmul.mubr.msk.f32.vlgmr.msra.gmra.mrb[12].mxu1 %vm44_vm0, %v1138_v22 }
 0xa72   :  { %v2748_v25 = vpop.f32.mrb[8].mxu0 }
 0xa73   :  { %v1312_v27 = vpop.f32.mrb[9].mxu0  ;;  %v3357_v31 = vadd.f32 %v2748_v25, %v1239_v24 }
 0xa74   :  { %v3359_v29 = vadd.f32 %v1312_v27, %v1239_v24 }
 0xa76   :  { %2749 = vmatprep.subr.msk.mxu1 %vm185_vm1, %v3359_v29 }
 0xa77   :  { %2750 = vmatpush3.xpose.msk.msra.mxu1 %vm185_vm1, %v3359_v29 }
 0xa78   :  { %2754 = vmatprep.subr.msk.mxu1 %vm185_vm1, %v3357_v31 }
 0xaf9   :  { %v2737_v30 = vpop.f32.mrb[12].mxu1 }
 0xafa   :  { %v1227_v60 = vpop.f32.mrb[13].mxu1  ;;  %v3372_v34 = vadd.f32 %v2737_v30, %v1142_v32 }
 0xafb   :  { %v1228_v33 = vadd.f32 %v1227_v60, %v1142_v32 }
 0xafd   :  { %1323 = vrot.lane.b32.xlu1 %v1228_v33, %s3048_s15  ;;  %2751 = vmatprep.mubr.msk.f32.mxu1 %vm185_vm1, %v1228_v33 }
 0xb01   :  { %1325 = vrot.lane.b32.xlu1 %v3372_v34, %s3048_s15 }
 0xb6f   :  { %v1324_v35 = vpop.permute.xlu1 %1323 }
 0xb70   :  { %2752 = vmatmul.mubr.msk.f32.vlgmr.msra.gmra.mrb[14].mxu1 %vm185_vm1, %v1324_v35 }
 0xb71   :  { %2755 = vmatpush3.xpose.msk.msra.mxu1 %vm185_vm1, %v3357_v31  ;;  %2756 = vmatprep.mubr.msk.f32.mxu1 %vm185_vm1, %v3372_v34 }
 0xb73   :  { %v1326_v28 = vpop.permute.xlu1 %1325 }
 0xb74   :  { %2757 = vmatmul.mubr.msk.f32.vlgmr.msra.gmra.mrb[16].mxu1 %vm185_vm1, %v1326_v28 }
 0xc43   :  { %v2753_v36 = vpop.f32.mrb[14].mxu1 }
 0xc44   :  { %v1492_v37 = vmul.f32 0.35355338, %v2753_v36  ;;  %v1400_v39 = vpop.f32.mrb[15].mxu1 }
 0xc45   :  { %v1491_v40 = vmul.f32 0.35355338, %v1400_v39 }
 0xc46   :  { %v1498_v41 = vsel %vm185_vm1, %v1492_v37, -inf }
 0xc47   :  { %1499 = vmax.xlane.f32.xlu1 %v1498_v41  ;;  %v2758_v1 = vpop.f32.mrb[16].mxu1  ;;  %v1495_v42 = vsel %vm185_vm1, %v1491_v40, -inf }
 0xc48   :  { %1496 = vmax.xlane.f32.xlu0 %v1495_v42  ;;  %v1482_v43 = vpop.f32.mrb[17].mxu1  ;;  %v1494_v45 = vmul.f32 0.35355338, %v2758_v1 }
 0xc49   :  { %v1493_v0 = vmul.f32 0.35355338, %v1482_v43 }
 0xc4a   :  { %v1504_v48 = vsel %vm185_vm1, %v1494_v45, -inf }
 0xc4b   :  { %v1501_v47 = vsel %vm185_vm1, %v1493_v0, -inf }
 0xc4c   :  { %1502 = vmax.xlane.f32.xlu0 %v1501_v47 }
 0xc50   :  { %1505 = vmax.xlane.f32.xlu0 %v1504_v48 }
 0xc58   :  { %1623 = vrot.lane.b32.xlu1 %v3357_v31, %s3051_s26 }
 0xc5c   :  { %1711 = vrot.lane.b32.xlu1 %v3359_v29, %s3048_s15 }
 0xc60   :  { %1798 = vrot.lane.b32.xlu1 %v3357_v31, %s3048_s15  ;;  %s3058_s15 = smov 104  }
 0xc64   :  { %1709 = vrot.lane.b32.xlu1 %v1324_v35, %s3051_s26 }
 0xc66   :  { %1539 = vrot.lane.b32.xlu0 %v3359_v29, %s3051_s26 }
 0xc6a   :  { %1707 = vrot.lane.b32.xlu0 %v1228_v33, %s3051_s26 }
 0xcd4   :  { %v1500_v49 = vpop.xlane.xlu1 %1499 }
 0xcd5   :  { %v1508_v51 = vsub.f32 %v1492_v37, %v1500_v49  ;;  %v1497_v44 = vpop.xlane.xlu0 %1496 }
 0xcd6   :  { %v1507_v46 = vsub.f32 %v1491_v40, %v1497_v44 }
 0xcd7   :  { %v1513_v50 = vmul.f32 1.442695, %v1508_v51 }
 0xcd8   :  { %v1511_v54 = vmul.f32 1.442695, %v1507_v46  ;;  %v1624_v16 = vpop.permute.xlu1 %1623 }
 0xcd9   :  { %2978 = vpow2.f32 %v1513_v50  ;;  %2764 = vmatprep.subr.mxu1 %v1624_v16  ;;  %v1503_v18 = vpop.xlane.xlu0 %1502 }
 0xcda   :  { %2980 = vpow2.f32 %v1511_v54  ;;  %v1509_v55 = vsub.f32 %v1493_v0, %v1503_v18  ;;  %2765 = vmatpush3.msra.mxu1 %v1624_v16 }
 0xcdc   :  { %v1515_v56 = vmul.f32 1.442695, %v1509_v55  ;;  %v1712_v57 = vpop.permute.xlu1 %1711 }
 0xcdd   :  { %v1506_v58 = vpop.xlane.xlu0 %1505 }
 0xcde   :  { %2982 = vpow2.f32 %v1515_v56  ;;  %v1510_v59 = vsub.f32 %v1494_v45, %v1506_v58 }
 0xce0   :  { %v1517_v61 = vmul.f32 1.442695, %v1510_v59  ;;  %v1799_v62 = vpop.permute.xlu1 %1798 }
 0xce1   :  { %2774 = vmatprep.subr.msk.mxu1 %vm185_vm1, %v1799_v62  ;;  %v1540_v63 = vpop.permute.xlu0 %1539 }
 0xce2   :  { %2984 = vpow2.f32 %v1517_v61  ;;  %2759 = vmatprep.subr.mxu0 %v1540_v63 }
 0xce3   :  { %v2979_v2 = vpop.eup %2978  ;;  %2760 = vmatpush3.msra.mxu0 %v1540_v63 }
 0xce4   :  { %v2981_v3 = vpop.eup %2980  ;;  %2769 = vmatprep.subr.msk.mxu0 %vm185_vm1, %v1712_v57  ;;  %v1522_v4 = vsel %vm185_vm1, %v2979_v2, 0.0  ;;  %v1710_v12 = vpop.permute.xlu1 %1709 }
 0xce5   :  { %1523 = vadd.xlane.f32.xlu1 %v1522_v4  ;;  %v1519_v5 = vsel %vm185_vm1, %v2981_v3, 0.0  ;;  %v1708_v13 = vpop.permute.xlu0 %1707 }
 0xce6   :  { %1520 = vadd.xlane.f32.xlu0 %v1519_v5 }
 0xce8   :  { %v2983_v8 = vpop.eup %2982 }
 0xce9   :  { %v1525_v9 = vsel %vm185_vm1, %v2983_v8, 0.0 }
 0xcea   :  { %1526 = vadd.xlane.f32.xlu0 %v1525_v9 }
 0xcec   :  { %v2985_v10 = vpop.eup %2984 }
 0xced   :  { %v1528_v11 = vsel %vm185_vm1, %v2985_v10, 0.0 }
 0xcee   :  { %1529 = vadd.xlane.f32.xlu1 %v1528_v11  ;;  %v2928_v11 = vpack.i.bf16 %v3317_v14, %v3312_v53 }
 0xcff   :  { %1796 = vrot.lane.b32.xlu1 %v1326_v28, %s3051_s26 }
 0xd00   :  { %1794 = vrot.lane.b32.xlu0 %v3372_v34, %s3051_s26 }
 0xd72   :  { %v1524_v17 = vpop.xlane.xlu1 %1523 }
 0xd73   :  { %2986 = vrcp.f32 %v1524_v17  ;;  %v1521_v19 = vpop.xlane.xlu0 %1520 }
 0xd74   :  { %2988 = vrcp.f32 %v1521_v19 }
 0xd77   :  { %v1527_v20 = vpop.xlane.xlu0 %1526 }
 0xd78   :  { %2990 = vrcp.f32 %v1527_v20 }
 0xd7b   :  { %v1530_v21 = vpop.xlane.xlu1 %1529  ;;  %v1795_v34 = vpop.permute.xlu0 %1794 }
 0xd7c   :  { %2992 = vrcp.f32 %v1530_v21 }
 0xd7d   :  { %v2987_v22 = vpop.eup %2986 }
 0xd7e   :  { %v2989_v24 = vpop.eup %2988  ;;  %v3407_v27 = vmul.f32 %v2987_v22, %v2979_v2 }
 0xd7f   :  { %v3405_v25 = vmul.f32 %v2989_v24, %v2981_v3  ;;  %v1797_v35 = vpop.permute.xlu1 %1796 }
 0xd81   :  { %2761 = vmatprep.mubr.msk.f32.mxu0 %vm185_vm1, %v3405_v25 }
 0xd82   :  { %v2991_v32 = vpop.eup %2990  ;;  %2762 = vmatmul.mubr.msk.f32.vlgmr.msra.gmra.mrb[10].mxu0 %vm185_vm1, %v3407_v27 }
 0xd83   :  { %2770 = vmatpush3.xpose.msk.msra.mxu0 %vm185_vm1, %v1712_v57  ;;  %2771 = vmatprep.mubr.msk.f32.mxu0 %vm185_vm1, %v1708_v13  ;;  %v3415_v30 = vmul.f32 %v2991_v32, %v2983_v8 }
 0xd85   :  { %2766 = vmatprep.mubr.msk.f32.mxu1 %vm185_vm1, %v3415_v30 }
 0xd86   :  { %v2993_v60 = vpop.eup %2992  ;;  %2772 = vmatmul.mubr.msk.f32.vlgmr.msra.gmra.mrb[12].mxu0 %vm185_vm1, %v1710_v12  ;;  %v2933_v12 = vpack.i.bf16 %v3329_v52, %v3322_v15 }
 0xd87   :  { %v3420_v33 = vmul.f32 %v2993_v60, %v2985_v10 }
 0xd89   :  { %2767 = vmatmul.mubr.msk.f32.vlgmr.msra.gmra.mrb[18].mxu1 %vm185_vm1, %v3420_v33 }
 0xd8a   :  { %2775 = vmatpush3.xpose.msk.msra.mxu1 %vm185_vm1, %v1799_v62  ;;  %2776 = vmatprep.mubr.msk.f32.mxu1 %vm185_vm1, %v1795_v34 }
 0xd8d   :  { %2777 = vmatmul.mubr.msk.f32.vlgmr.msra.gmra.mrb[20].mxu1 %vm185_vm1, %v1797_v35 }
 0xe55   :  { %v2763_v28 = vpop.f32.mrb[10].mxu0 }
 0xe56   :  { %v3427_v36 = vpop.f32.mrb[11].mxu0 }
 0xe59   :  { %v2773_v37 = vpop.f32.mrb[12].mxu0 }
 0xe5a   :  { %v1882_v39 = vmul.f32 0.35355338, %v2773_v37  ;;  %v1785_v40 = vpop.f32.mrb[13].mxu0 }
 0xe5b   :  { %v1881_v41 = vmul.f32 0.35355338, %v1785_v40 }
 0xe5c   :  { %v2768_v1 = vpop.f32.mrb[18].mxu1  ;;  %v1888_v42 = vsel %vm185_vm1, %v1882_v39, -inf }
 0xe5d   :  { %1889 = vmax.xlane.f32.xlu1 %v1888_v42  ;;  %v3430_v43 = vpop.f32.mrb[19].mxu1  ;;  %v1885_v0 = vsel %vm185_vm1, %v1881_v41, -inf }
 0xe5e   :  { %1886 = vmax.xlane.f32.xlu0 %v1885_v0 }
 0xe60   :  { %v2778_v45 = vpop.f32.mrb[20].mxu1 }
 0xe61   :  { %v1872_v47 = vpop.f32.mrb[21].mxu1  ;;  %v1884_v49 = vmul.f32 0.35355338, %v2778_v45 }
 0xe62   :  { %v1883_v48 = vmul.f32 0.35355338, %v1872_v47 }
 0xe63   :  { %v1894_v44 = vsel %vm185_vm1, %v1884_v49, -inf }
 0xe64   :  { %v1891_v51 = vsel %vm185_vm1, %v1883_v48, -inf }
 0xe65   :  { %1892 = vmax.xlane.f32.xlu0 %v1891_v51 }
 0xe69   :  { %1895 = vmax.xlane.f32.xlu0 %v1894_v44 }
 0xeea   :  { %v1890_v46 = vpop.xlane.xlu1 %1889 }
 0xeeb   :  { %v1898_v50 = vsub.f32 %v1882_v39, %v1890_v46  ;;  %v1887_v54 = vpop.xlane.xlu0 %1886 }
 0xeec   :  { %v1897_v16 = vsub.f32 %v1881_v41, %v1887_v54 }
 0xeed   :  { %v1903_v18 = vmul.f32 1.442695, %v1898_v50 }
 0xeee   :  { %v1901_v55 = vmul.f32 1.442695, %v1897_v16 }
 0xeef   :  { %2994 = vpow2.f32 %v1903_v18 }
 0xef0   :  { %2996 = vpow2.f32 %v1901_v55 }
 0xef2   :  { %v1893_v56 = vpop.xlane.xlu0 %1892 }
 0xef3   :  { %v1899_v57 = vsub.f32 %v1883_v48, %v1893_v56 }
 0xef5   :  { %v1905_v58 = vmul.f32 1.442695, %v1899_v57 }
 0xef6   :  { %v1896_v59 = vpop.xlane.xlu0 %1895 }
 0xef7   :  { %2998 = vpow2.f32 %v1905_v58  ;;  %v1900_v61 = vsub.f32 %v1884_v49, %v1896_v59 }
 0xef9   :  { %v2995_v62 = vpop.eup %2994  ;;  %v1907_v63 = vmul.f32 1.442695, %v1900_v61 }
 0xefa   :  { %v2997_v2 = vpop.eup %2996  ;;  %v1912_v3 = vsel %vm185_vm1, %v2995_v62, 0.0 }
 0xefb   :  { %3000 = vpow2.f32 %v1907_v63  ;;  %1913 = vadd.xlane.f32.xlu1 %v1912_v3  ;;  %v1909_v4 = vsel %vm185_vm1, %v2997_v2, 0.0 }
 0xefc   :  { %1910 = vadd.xlane.f32.xlu0 %v1909_v4 }
 0xf01   :  { %v2999_v5 = vpop.eup %2998 }
 0xf02   :  { %v1915_v8 = vsel %vm185_vm1, %v2999_v5, 0.0 }
 0xf03   :  { %1916 = vadd.xlane.f32.xlu0 %v1915_v8 }
 0xf05   :  { %v3001_v9 = vpop.eup %3000 }
 0xf06   :  { %v1918_v10 = vsel %vm185_vm1, %v3001_v9, 0.0 }
 0xf07   :  { %1919 = vadd.xlane.f32.xlu1 %v1918_v10 }
 0xf18   :  { %2013 = vrot.lane.b32.xlu1 %v3357_v31, %s3058_s15 }
 0xf19   :  { %1929 = vrot.lane.b32.xlu0 %v3359_v29, %s3058_s15 }
 0xf1c   :  { %2929 = vrot.lane.b32.xlu1 %v2928_v11, %s3047_s14  ;;  %v29_v11 = vld [vmem:[%s3590_s4 + $0x8] sm:$0xff] }
 0xf1d   :  { %2099 = vrot.lane.b32.xlu0 %v2763_v28, %s3054_s12 }
 0xf20   :  { %2934 = vrot.lane.b32.xlu1 %v2933_v12, %s3047_s14  ;;  %v32_v12 = vld [vmem:[%s3590_s4 + $0x20] sm:$0xff] }
 0xf24   :  { %2101 = vrot.lane.b32.xlu1 %v2768_v1, %s3054_s12 }
 0xf88   :  { %v1914_v13 = vpop.xlane.xlu1 %1913 }
 0xf89   :  { %3002 = vrcp.f32 %v1914_v13  ;;  %v1911_v17 = vpop.xlane.xlu0 %1910  ;;  %v2870_v13 = vpack.c.bf16 %v32_v12, %v29_v11 }
 0xf8a   :  { %3004 = vrcp.f32 %v1911_v17  ;;  %v35_v17 = vld [vmem:[%s3590_s4 + $0x38] sm:$0xff] }
 0xf90   :  { %v1917_v31 = vpop.xlane.xlu0 %1916 }
 0xf91   :  { %3006 = vrcp.f32 %v1917_v31  ;;  %v38_v31 = vld [vmem:[%s3590_s4 + $0x50] sm:$0xff] }
 0xf93   :  { %v3003_v53 = vpop.eup %3002 }
 0xf94   :  { %v3005_v14 = vpop.eup %3004  ;;  %v1920_v29 = vpop.xlane.xlu1 %1919  ;;  %v3451_v15 = vmul.f32 %v3003_v53, %v2995_v62  ;;  %v2874_v53 = vpack.c.bf16 %v38_v31, %v35_v17 }
 0xf95   :  { %v1930_v19 = vpop.permute.xlu0 %1929  ;;  %3008 = vrcp.f32 %v1920_v29  ;;  %v3449_v20 = vmul.f32 %v3005_v14, %v2997_v2 }
 0xf96   :  { %2779 = vmatprep.subr.mxu0 %v1930_v19 }
 0xf97   :  { %2780 = vmatpush3.msra.mxu0 %v1930_v19  ;;  %2781 = vmatprep.mubr.msk.f32.mxu0 %vm185_vm1, %v3449_v20 }
 0xf98   :  { %v2014_v52 = vpop.permute.xlu1 %2013  ;;  %2782 = vmatmul.mubr.msk.f32.vlgmr.msra.gmra.mrb[14].mxu0 %vm185_vm1, %v3451_v15 }
 0xf99   :  { %2784 = vmatprep.subr.mxu1 %v2014_v52  ;;  %v2100_v47 = vpop.permute.xlu0 %2099 }
 0xf9a   :  { %2785 = vmatpush3.msra.mxu1 %v2014_v52  ;;  %v2121_v49 = vsel %vm185_vm1, %v3427_v36, %v2100_v47  ;;  %v2255_v36 = vrot.slane %v3352_v23, %v1129_v6 }
 0xf9b   :  { %v3007_v21 = vpop.eup %3006  ;;  %2871 = vmatprep.subr.bf16.mxu1 %v2870_v13 }
 0xf9c   :  { %v2930_v22 = vpop.permute.xlu1 %2929  ;;  %v3457_v24 = vmul.f32 %v3007_v21, %v2999_v5 }
 0xf9d   :  { %v2932_v32 = vunpack.i.h.bf16 %v2930_v22  ;;  %v2931_v60 = vunpack.i.l.bf16 %v2930_v22 }
 0xf9e   :  { %2786 = vmatprep.mubr.msk.f32.mxu1 %vm185_vm1, %v3457_v24 }
 0xf9f   :  { %v3009_v34 = vpop.eup %3008  ;;  %v2862_v35 = vpack.c.bf16 %v2932_v32, %v2931_v60  ;;  %v2286_v32 = vsub.s32 4, %v3143_v26  ;;  %v2292_v60 = vsub.s32 5, %v3143_v26  ;;  %v2401_v26 = vld [vmem:[%s3591_s5] sm:$0xff] }
 0xfa0   :  { %v3461_v28 = vmul.f32 %v3009_v34, %v3001_v9  ;;  %v2935_v37 = vpop.permute.xlu1 %2934  ;;  %v3022_v34 = vld [vmem:[%s3589_s3] sm:$0xff] }
 0xfa1   :  { %v2937_v39 = vunpack.i.h.bf16 %v2935_v37  ;;  %v2936_v40 = vunpack.i.l.bf16 %v2935_v37  ;;  %2863 = vmatprep.subr.bf16.mxu0 %v2862_v35 }
 0xfa2   :  { %2787 = vmatmul.mubr.msk.f32.vlgmr.msra.gmra.mrb[22].mxu1 %vm185_vm1, %v3461_v28  ;;  %2865 = vmatpush3.bf16.msra.mxu0 %v2862_v35  ;;  %v2287_v35 = vrot.slane %v3022_v34, %v2286_v32 }
 0xfa3   :  { %v2866_v41 = vpack.c.bf16 %v2937_v39, %v2936_v40  ;;  %2873 = vmatpush3.bf16.msra.mxu1 %v2870_v13  ;;  %v2293_v40 = vrot.slane %v3022_v34, %v2292_v60 }
 0xfa4   :  { %v2102_v50 = vpop.permute.xlu1 %2101  ;;  %2875 = vmatprep.subr.bf16.mxu1 %v2874_v53 }
 0xfa5   :  { %2867 = vmatprep.subr.bf16.mxu0 %v2866_v41  ;;  %v2122_v16 = vsel %vm185_vm1, %v3430_v43, %v2102_v50  ;;  %v2405_v50 = vld [vmem:[%s3591_s5 + $0x20] sm:$0xff] }
 0xfa6   :  { %2869 = vmatpush3.bf16.msra.mxu0 %v2866_v41 }
 0xfa7   :  { %2877 = vmatpush3.bf16.msra.mxu1 %v2874_v53 }
0x106b   :  { %v2783_v1 = vpop.f32.mrb[14].mxu0 }
0x106c   :  { %v2004_v42 = vpop.f32.mrb[15].mxu0 }
0x106d   :  { %2107 = vrot.lane.b32.xlu0 %v2004_v42, %s3055_s13 }
0x1071   :  { %2115 = vrot.lane.b32.xlu0 %v2783_v1, %s3056_s16 }
0x1075   :  { %v2788_v0 = vpop.f32.mrb[22].mxu1 }
0x1076   :  { %v2088_v45 = vpop.f32.mrb[23].mxu1 }
0x1077   :  { %2109 = vrot.lane.b32.xlu1 %v2088_v45, %s3055_s13 }
0x107b   :  { %2117 = vrot.lane.b32.xlu1 %v2788_v0, %s3056_s16 }
0x10df   :  { %v2108_v48 = vpop.permute.xlu0 %2107 }
0x10e0   :  { %v2123_v51 = vsel %vm990_vm2, %v2121_v49, %v2108_v48  ;;  %v2402_v48 = vld [vmem:[%s3591_s5 + $0x8] sm:$0xff]  ;;  %v2403_v49 = vld [vmem:[%s3591_s5 + $0x10] sm:$0xff] }
0x10e3   :  { %v2116_v44 = vpop.permute.xlu0 %2115 }
0x10e4   :  { %v2125_v46 = vsel %vm993_vm3, %v2123_v51, %v2116_v44  ;;  %v2878_v51 = vpack.c.bf16 %v2402_v48, %v2401_v26  ;;  %v2404_v44 = vld [vmem:[%s3591_s5 + $0x18] sm:$0xff] }
0x10e5   :  { %2797 = vmatprep.mubr.msk.f32.mxu0 %vm44_vm0, %v2125_v46  ;;  %v2882_v46 = vpack.c.bf16 %v2404_v44, %v2403_v49 }
0x10e6   :  { %2879 = vmatprep.subr.bf16.mxu0 %v2878_v51 }
0x10e9   :  { %v2110_v54 = vpop.permute.xlu1 %2109 }
0x10ea   :  { %v2124_v18 = vsel %vm990_vm2, %v2122_v16, %v2110_v54  ;;  %v2406_v54 = vld [vmem:[%s3591_s5 + $0x28] sm:$0xff] }
0x10eb   :  { %v2886_v16 = vpack.c.bf16 %v2406_v54, %v2405_v50 }
0x10ed   :  { %v2118_v55 = vpop.permute.xlu1 %2117 }
0x10ee   :  { %v2126_v56 = vsel %vm993_vm3, %v2124_v18, %v2118_v55  ;;  %v2407_v18 = vld [vmem:[%s3591_s5 + $0x30] sm:$0xff]  ;;  %v2408_v55 = vld [vmem:[%s3591_s5 + $0x38] sm:$0xff] }
0x10ef   :  { %2798 = vmatmul.mubr.msk.f32.vlgmr.msra.gmra.mrb[16].mxu0 %vm44_vm0, %v2126_v56  ;;  %v2890_v56 = vpack.c.bf16 %v2408_v55, %v2407_v18 }
0x10f0   :  { %2881 = vmatpush3.bf16.msra.mxu0 %v2878_v51 }
0x10f1   :  { %2883 = vmatprep.subr.bf16.mxu0 %v2882_v46 }
0x10f4   :  { %2885 = vmatpush3.bf16.msra.mxu0 %v2882_v46 }
0x10f5   :  { %2887 = vmatprep.subr.bf16.mxu0 %v2886_v16 }
0x10f8   :  { %2889 = vmatpush3.bf16.msra.mxu0 %v2886_v16 }
0x10f9   :  { %2891 = vmatprep.subr.bf16.mxu0 %v2890_v56 }
0x10fc   :  { %2893 = vmatpush3.bf16.msra.mxu0 %v2890_v56 }
0x11c2   :  { %v2799_v57 = vpop.f32.mrb[16].mxu0 }
0x11c3   :  { %v2251_v58 = vadd.f32 %v2799_v57, %v3295_v38  ;;  %v2241_v59 = vpop.f32.mrb[17].mxu0 }
0x11c4   :  { %v2250_v61 = vadd.f32 %v2241_v59, %v3297_v7 }
0x11c5   :  { %v3484_v62 = vadd.f32 %v2255_v36, %v2251_v58 }
0x11c6   :  { %v3486_v43 = vadd.f32 %v2255_v36, %v2250_v61 }
0x11c7   :  { %v2261_v63 = vsel %vm44_vm0, %v3484_v62, 0.0 }
0x11c8   :  { %2262 = vadd.xlane.f32.xlu1 %v2261_v63  ;;  %v2258_v2 = vsel %vm44_vm0, %v3486_v43, 0.0 }
0x11c9   :  { %2259 = vadd.xlane.f32.xlu0 %v2258_v2 }
0x1255   :  { %v2263_v3 = vpop.xlane.xlu1 %2262 }
0x1256   :  { %v2265_v6 = vmul.f32 0.03125, %v2263_v3  ;;  %v2260_v23 = vpop.xlane.xlu0 %2259 }
0x1257   :  { %v2264_v4 = vmul.f32 0.03125, %v2260_v23 }
0x1258   :  { %v2267_v38 = vsub.f32 %v3484_v62, %v2265_v6 }
0x1259   :  { %v2266_v7 = vsub.f32 %v3486_v43, %v2264_v4 }
0x125a   :  { %v2269_v9 = vmul.f32 %v2267_v38, %v2267_v38 }
0x125b   :  { %v2268_v5 = vmul.f32 %v2266_v7, %v2266_v7 }
0x125c   :  { %v2273_v10 = vsel %vm44_vm0, %v2269_v9, 0.0 }
0x125d   :  { %v2270_v8 = vsel %vm44_vm0, %v2268_v5, 0.0 }
0x125e   :  { %2271 = vadd.xlane.f32.xlu0 %v2270_v8 }
0x1262   :  { %2274 = vadd.xlane.f32.xlu0 %v2273_v10 }
0x12eb   :  { %v2272_v14 = vpop.xlane.xlu0 %2271 }
0x12ec   :  { %v2276_v29 = vmul.f32 0.03125, %v2272_v14 }
0x12ee   :  { %v2278_v19 = vadd.f32 1e-05, %v2276_v29 }
0x12ef   :  { %v2275_v52 = vpop.xlane.xlu0 %2274 }
0x12f0   :  { %3010 = vrsqrt.f32 %v2278_v19  ;;  %v2277_v21 = vmul.f32 0.03125, %v2275_v52 }
0x12f2   :  { %v2279_v22 = vadd.f32 1e-05, %v2277_v21 }
0x12f4   :  { %3012 = vrsqrt.f32 %v2279_v22 }
0x12fa   :  { %v3011_v37 = vpop.eup %3010 }
0x12fb   :  { %v2282_v39 = vmul.f32 %v3011_v37, %v2266_v7 }
0x12fd   :  { %v2288_v41 = vmul.f32 %v2287_v35, %v2282_v39 }
0x12fe   :  { %v3013_v1 = vpop.eup %3012 }
0x12ff   :  { %v2283_v42 = vmul.f32 %v3013_v1, %v2267_v38  ;;  %v2294_v0 = vadd.f32 %v2293_v40, %v2288_v41 }
0x1301   :  { %v2289_v45 = vmul.f32 %v2287_v35, %v2283_v42  ;;  %2808 = vmatprep.mubr.msk.f32.mxu1 %vm44_vm0, %v2294_v0 }
0x1303   :  { %v2295_v47 = vadd.f32 %v2293_v40, %v2289_v45 }
0x1305   :  { %2809 = vmatmul.mubr.msk.f32.vlgmr.msra.gmra.mrb[24].mxu1 %vm44_vm0, %v2295_v47 }
0x13d8   :  { %v2810_v36 = vpop.f32.mrb[24].mxu1 }
0x13d9   :  { %2395 = vrot.lane.b32.xlu1 %v2810_v36, %s3053_s11  ;;  %v2368_v57 = vpop.f32.mrb[25].mxu1  ;;  %v2568_v59 = vmul.f32 -1.442695, %v2810_v36 }
0x13da   :  { %2393 = vrot.lane.b32.xlu0 %v2368_v57, %s3053_s11  ;;  %v2567_v58 = vmul.f32 -1.442695, %v2368_v57 }
0x13dc   :  { %3014 = vpow2.f32 %v2567_v58 }
0x13dd   :  { %2127 = vrot.lane.b32.xlu1 %v3407_v27, %s3054_s12  ;;  %3016 = vpow2.f32 %v2568_v59 }
0x13de   :  { %2133 = vrot.lane.b32.xlu0 %v3449_v20, %s3055_s13 }
0x13e1   :  { %2129 = vrot.lane.b32.xlu1 %v3420_v33, %s3054_s12 }
0x13e2   :  { %2139 = vrot.lane.b32.xlu0 %v3451_v15, %s3056_s16 }
0x13e5   :  { %2135 = vrot.lane.b32.xlu1 %v3457_v24, %s3055_s13 }
0x13e6   :  { %v3015_v27 = vpop.eup %3014 }
0x13e7   :  { %v3017_v61 = vpop.eup %3016  ;;  %v2383_v63 = vadd.f32 1.0, %v3015_v27 }
0x13e8   :  { %v2384_v20 = vadd.f32 1.0, %v3017_v61 }
0x13e9   :  { %2141 = vrot.lane.b32.xlu1 %v3461_v28, %s3056_s16  ;;  %3018 = vrcp.f32 %v2383_v63 }
0x13ea   :  { %3020 = vrcp.f32 %v2384_v20 }
0x13f3   :  { %v3019_v33 = vpop.eup %3018 }
0x13f4   :  { %v3021_v2 = vpop.eup %3020  ;;  %v2389_v3 = vmul.f32 %v3019_v33, %v2368_v57 }
0x13f5   :  { %v2390_v6 = vmul.f32 %v3021_v2, %v2810_v36 }
0x144b   :  { %v2396_v15 = vpop.permute.xlu1 %2395 }
0x144c   :  { %v2394_v23 = vpop.permute.xlu0 %2393  ;;  %v2400_v4 = vmul.f32 %v2396_v15, %v2390_v6 }
0x144d   :  { %v2399_v24 = vmul.f32 %v2394_v23, %v2389_v3 }
0x144f   :  { %v2128_v28 = vpop.permute.xlu1 %2127  ;;  %2827 = vmatprep.mubr.msk.f32.mxu0 %vm2409_vm4, %v2399_v24 }
0x1450   :  { %v2134_v38 = vpop.permute.xlu0 %2133  ;;  %2828 = vmatmul.mubr.msk.f32.vlgmr.msra.gmra.mrb[18].mxu0 %vm2409_vm4, %v2400_v4  ;;  %v2145_v7 = vsel %vm185_vm1, %v3405_v25, %v2128_v28 }
0x1451   :  { %v2147_v8 = vsel %vm990_vm2, %v2145_v7, %v2134_v38 }
0x1453   :  { %v2130_v5 = vpop.permute.xlu1 %2129 }
0x1454   :  { %v2140_v9 = vpop.permute.xlu0 %2139  ;;  %v2146_v12 = vsel %vm185_vm1, %v3415_v30, %v2130_v5 }
0x1455   :  { %v2149_v10 = vsel %vm993_vm3, %v2147_v8, %v2140_v9 }
0x1456   :  { %2151 = vst.msk [vmem:[%s3593_s7] sm:$0xff] %vm44_vm0, %v2149_v10 }
0x1457   :  { %v2136_v11 = vpop.permute.xlu1 %2135 }
0x1458   :  { %v2148_v13 = vsel %vm990_vm2, %v2146_v12, %v2136_v11 }
0x145b   :  { %v2142_v17 = vpop.permute.xlu1 %2141 }
0x145c   :  { %v2150_v25 = vsel %vm993_vm3, %v2148_v13, %v2142_v17 }
0x145d   :  { %2152 = vst.msk [vmem:[%s3593_s7 + $0x8] sm:$0xff] %vm44_vm0, %v2150_v25 }
0x1523   :  { %v2829_v31 = vpop.f32.mrb[18].mxu0 }
0x1524   :  { %v2492_v53 = vadd.f32 %v2829_v31, %v3484_v62  ;;  %v2482_v14 = vpop.f32.mrb[19].mxu0 }
0x1525   :  { %v2491_v29 = vadd.f32 %v2482_v14, %v3486_v43 }
0x1526   :  { %2494 = vst.msk [vmem:[#allocation2 + $0x8] sm:$0xff] %vm44_vm0, %v2492_v53 }
0x1527   :  { %2493 = vst.msk [vmem:[#allocation2] sm:$0xff] %vm44_vm0, %v2491_v29 }
0x1528   :  { %3034 = shalt.err (!%p3031_p4)
}
0x1529   :  { %s3035_s17 = scalar_lea.hbm %s3592_s6, 256 }
0x152a   :  { %p3036_p5 = scmp.ne.s32.totalorder %s3592_s6, %s3035_s17  ;;  %p3039_p6 = scmp.lt.u32.totalorder %s3035_s17, %s3592_s6 }
0x152c   :  { %p3041_p7 = pnand %p3039_p6, %p3036_p5 }
0x152e   :  { %3044 = shalt.err (!%p3041_p7)
}
0x152f   :  { %s3060_s21 = smov 128  }
0x1530   :  { %2506 = dma.vmem_to_hbm [thread:$0]  %s2501_s9, 256, %s3592_s6, [#allocation3], %s3060_s21, %s3060_s21, %s3054_s12  }
0x1531   :  { %3045 = dma.done.wait [#allocation3], 256  }
0x1532   :  { %3046 = vsyncadd [#allocation3], 4294967040 }
0x1533   :  { %2514 = vsyncpa [#allocation3], 1 }

</bundles_post_ra>
